<compile_context>
chip_gen: v7x
topology: tpu7x:2x2x1
jax: 0.10.0
libtpu: 0.0.40
codegen_flags: <defaults>
</compile_context>

<pallas_src>
import functools

import jax
import jax.numpy as jnp
from jax import lax
from jax.experimental import pallas as pl
from jax.experimental.pallas import tpu as pltpu

KD, KH, KW = 5, 7, 7        # Conv3d kernel_size
SD, SH, SW = 1, 2, 2        # stride
PD, PH, PW = 2, 3, 3        # padding
COUT = 64                   # out_channels
EPS = 1e-5                  # BatchNorm3d eps

KHW = KH * KW               # 49 H/W taps per depth plane
KP = 64                     # taps padded with zeros -> clean contraction dim
CP = 128                    # COUT padded with zero columns -> lane-aligned acc/transpose


def _conv_bn_relu_kernel(x_ref, w_ref, b_ref, o_ref, *, td, howo):
    """One (batch, depth-tile): out[COUT, td*howo] = relu( sum_a P_a @ W_a + bias ).

    x_ref : [1, Dp*howo, KP]  bf16   per-batch H/W-window slab (resident across D-tiles)
    w_ref : [KD, KP, CP]      bf16   BN-scale-folded weights, one [KP, CP] per depth tap
    b_ref : [1, CP]           f32    folded conv-bias + BN shift
    o_ref : [1, COUT, td*howo] f32
    """
    tile_m = td * howo
    align = howo & (-howo)                       # largest power-of-two divisor of howo
    d0 = pl.program_id(1) * td                   # output-depth offset of this tile

    acc = None
    for a in range(KD):                          # depth taps gathered in-kernel (no HBM im2col)
        start = pl.multiple_of((d0 + a) * howo, align)
        p = x_ref[0, pl.ds(start, tile_m), :]    # [tile_m, KP] bf16
        c = jnp.dot(p, w_ref[a], preferred_element_type=jnp.float32)   # [tile_m, CP] f32
        acc = c if acc is None else acc + c

    acc = jnp.maximum(acc + b_ref[...], 0.0)     # f32 epilogue (scale already in weights)
    o_ref[0] = acc.T[:COUT, :]                   # [COUT, tile_m]: lane-dense unmasked store


def _hw_window(xp, ho, wo):
    """xp: [N, Dp, Hp, Wp] -> [N, Dp, ho*wo, 49]: the stride-(2,2) H/W window taps."""
    taps = []
    for b in range(KH):
        for c in range(KW):
            taps.append(xp[:, :, b:b + ho * SH:SH, c:c + wo * SW:SW])  # [N, Dp, ho, wo]
    cols = jnp.stack(taps, axis=-1)                                    # [N, Dp, ho, wo, 49]
    return cols.reshape(xp.shape[0], xp.shape[1], ho * wo, KHW)


def _pick_td(do, howo, max_rows=2048):
    """Largest depth-tile td | Do giving a lane-aligned M tile of <= max_rows rows."""
    best = 1
    for td in range(1, do + 1):
        if do % td == 0 and td * howo <= max_rows and (td * howo) % 128 == 0:
            best = td
    if (best * howo) % 128 != 0:     # fallback: one tile per batch (block == full dim)
        best = do
    return best


def video_net_forward(video, params):
    """video: [N, 1, D, H, W] f32 -> conv+BN(eval)+ReLU features [N, 64, D, H//2, W//2] f32."""
    w = params["conv_w"]          # [64, 1, 5, 7, 7]
    b_conv = params["conv_b"]     # [64]
    gamma, beta = params["bn_gamma"], params["bn_beta"]
    r_mean, r_var = params["bn_mean"], params["bn_var"]

    n = video.shape[0]
    x = video[:, 0]                                                    # squeeze C=1
    xp = jnp.pad(x, ((0, 0), (PD, PD), (PH, PH), (PW, PW)))
    dp, hp, wp = xp.shape[1], xp.shape[2], xp.shape[3]
    do = (dp - KD) // SD + 1
    ho = (hp - KH) // SH + 1
    wo = (wp - KW) // SW + 1
    howo = ho * wo
    m_pb = do * howo                                                   # output pixels / batch

    # ---- compact H/W-window tensor (bf16); depth taps handled inside the kernel ----
    xhw = _hw_window(xp, ho, wo)                                       # [N, Dp, howo, 49] f32
    xhw = jnp.pad(xhw, ((0, 0), (0, 0), (0, 0), (0, KP - KHW)))
    xhw = xhw.astype(jnp.bfloat16).reshape(n, dp * howo, KP)           # [N, Dp*howo, KP] bf16

    # ---- fold BN scale into the weights, conv bias + BN shift into a single bias ----
    scale = gamma / jnp.sqrt(r_var + EPS)                              # [64]
    bias = (b_conv - r_mean) * scale + beta                            # [64]
    wr = jnp.transpose(w[:, 0], (1, 2, 3, 0)).reshape(KD, KHW, COUT) * scale   # [5, 49, 64]
    wr = jnp.pad(wr, ((0, 0), (0, KP - KHW), (0, CP - COUT))).astype(jnp.bfloat16)
    bias = jnp.pad(bias, (0, CP - COUT)).reshape(1, CP).astype(jnp.float32)

    td = _pick_td(do, howo)
    tile_m = td * howo
    n_dt = do // td
    assert do % td == 0 and (tile_m % 128 == 0 or n_dt == 1), (do, td, howo)

    out = pl.pallas_call(
        functools.partial(_conv_bn_relu_kernel, td=td, howo=howo),
        out_shape=jax.ShapeDtypeStruct((n, COUT, m_pb), jnp.float32),
        grid_spec=pltpu.PrefetchScalarGridSpec(
            num_scalar_prefetch=0,
            grid=(n, n_dt),
            in_specs=[
                # whole per-batch slab; block index constant over j -> resident, read once
                pl.BlockSpec((1, dp * howo, KP), lambda b, j: (b, 0, 0)),
                pl.BlockSpec((KD, KP, CP), lambda b, j: (0, 0, 0)),    # weights (resident)
                pl.BlockSpec((1, CP), lambda b, j: (0, 0)),            # folded bias
            ],
            out_specs=pl.BlockSpec((1, COUT, tile_m), lambda b, j: (b, 0, j)),
        ),
        compiler_params=pltpu.CompilerParams(
            dimension_semantics=("parallel", "arbitrary")),
    )(xhw, wr, bias)

    # NCDHW is a pure reshape of [N, COUT, Do*Ho*Wo] -- no HBM transpose of the output.
    return out.reshape(n, COUT, do, ho, wo)


def init_params(key):
    """Deterministic synthetic parameters matching nn.Conv3d / nn.BatchNorm3d shapes."""
    k0, k1, k2, k3, k4, k5 = jax.random.split(key, 6)
    fan_in = 1 * KD * KH * KW
    bound = 1.0 / jnp.sqrt(fan_in)
    return {
        "conv_w": jax.random.uniform(k0, (COUT, 1, KD, KH, KW), jnp.float32, -bound, bound),
        "conv_b": jax.random.uniform(k1, (COUT,), jnp.float32, -bound, bound),
        "bn_gamma": 1.0 + 0.1 * jax.random.normal(k2, (COUT,), jnp.float32),
        "bn_beta": 0.1 * jax.random.normal(k3, (COUT,), jnp.float32),
        "bn_mean": 0.05 * jax.random.normal(k4, (COUT,), jnp.float32),
        "bn_var": jnp.abs(1.0 + 0.1 * jax.random.normal(k5, (COUT,), jnp.float32)),
    }


if __name__ == "__main__":
    key = jax.random.PRNGKey(0)
    pkey, xkey = jax.random.split(key)
    params = init_params(pkey)

    # small NCDHW video: batch=2, channels=1, depth=8, spatial=16x16
    video = jax.random.normal(xkey, (2, 1, 8, 16, 16), jnp.float32)

    fwd = jax.jit(video_net_forward)
    out = jax.block_until_ready(fwd(video, params))
    assert out.shape == (2, 64, 8, 8, 8), out.shape

    # reference: f32 lax 3-D conv + folded eval-mode BN + ReLU
    ref = lax.conv_general_dilated(
        video, params["conv_w"],
        window_strides=(SD, SH, SW),
        padding=((PD, PD), (PH, PH), (PW, PW)),
        dimension_numbers=("NCDHW", "OIDHW", "NCDHW"),
        precision=lax.Precision.HIGHEST,
    ) + params["conv_b"].reshape(1, COUT, 1, 1, 1)
    scale = (params["bn_gamma"] / jnp.sqrt(params["bn_var"] + EPS)).reshape(1, COUT, 1, 1, 1)
    ref = jnp.maximum(
        (ref - params["bn_mean"].reshape(1, COUT, 1, 1, 1)) * scale
        + params["bn_beta"].reshape(1, COUT, 1, 1, 1), 0.0)

    max_err = float(jnp.max(jnp.abs(out - ref)))
    # bf16 matmul inputs (per perf review) vs. f32 reference => relaxed absolute tolerance
    assert max_err < 2e-2, f"mismatch vs reference: {max_err}"
    print("KERNEL_OK")
</pallas_src>

<mosaic_0001>
module attributes {stable_mosaic.version = 11 : i64} {
  func.func @_conv_bn_relu_kernel(%arg0: i32, %arg1: i32, %arg2: memref<1x768x64xbf16, #tpu.memory_space<vmem>>, %arg3: memref<5x64x128xbf16, #tpu.memory_space<vmem>>, %arg4: memref<1x128xf32, #tpu.memory_space<vmem>>, %arg5: memref<1x64x512xf32, #tpu.memory_space<vmem>>) attributes {dimension_semantics = [#tpu.dimension_semantics<parallel>, #tpu.dimension_semantics<arbitrary>], iteration_bounds = array<i64: 2, 1>, scalar_prefetch = 0 : i64, scratch_operands = 0 : i64, tpu.core_type = #tpu.core_type<tc>, window_params = [{transform_indices = @transform_0, window_bounds = array<i64: 1, 768, 64>}, {pipeline_mode = #tpu.pipeline_mode<synchronous>, transform_indices = @transform_1, window_bounds = array<i64: 5, 64, 128>}, {pipeline_mode = #tpu.pipeline_mode<synchronous>, transform_indices = @transform_2, window_bounds = array<i64: 1, 128>}, {transform_indices = @transform_3, window_bounds = array<i64: 1, 64, 512>}]} {
    %c8_i32 = arith.constant 8 : i32
    %0 = arith.muli %arg1, %c8_i32 : i32
    %c0_i32 = arith.constant 0 : i32
    %1 = arith.addi %0, %c0_i32 : i32
    %c64_i32 = arith.constant 64 : i32
    %2 = arith.muli %1, %c64_i32 : i32
    %3 = tpu.assume_multiple %2, 64 : i32
    %c0 = arith.constant 0 : index
    %4 = arith.index_cast %3 : i32 to index
    %c0_0 = arith.constant 0 : index
    %5 = vector.load %arg2[%c0, %4, %c0_0] : memref<1x768x64xbf16, #tpu.memory_space<vmem>>, vector<1x512x64xbf16>
    %6 = vector.shape_cast %5 : vector<1x512x64xbf16> to vector<512x64xbf16>
    %c0_1 = arith.constant 0 : index
    %c0_2 = arith.constant 0 : index
    %c0_3 = arith.constant 0 : index
    %7 = vector.load %arg3[%c0_1, %c0_2, %c0_3] : memref<5x64x128xbf16, #tpu.memory_space<vmem>>, vector<1x64x128xbf16>
    %8 = vector.shape_cast %7 : vector<1x64x128xbf16> to vector<64x128xbf16>
    %cst = arith.constant dense<0.000000e+00> : vector<512x128xf32>
    %9 = tpu.matmul %6, %8, %cst {dimension_numbers = #tpu.dot_dimension_numbers<[1], [0], [0], [1], [0, 0, 1, 1], [], []>} : vector<512x64xbf16>, vector<64x128xbf16>, vector<512x128xf32> -> vector<512x128xf32>
    %c1_i32 = arith.constant 1 : i32
    %10 = arith.addi %0, %c1_i32 : i32
    %c64_i32_4 = arith.constant 64 : i32
    %11 = arith.muli %10, %c64_i32_4 : i32
    %12 = tpu.assume_multiple %11, 64 : i32
    %c0_5 = arith.constant 0 : index
    %13 = arith.index_cast %12 : i32 to index
    %c0_6 = arith.constant 0 : index
    %14 = vector.load %arg2[%c0_5, %13, %c0_6] : memref<1x768x64xbf16, #tpu.memory_space<vmem>>, vector<1x512x64xbf16>
    %15 = vector.shape_cast %14 : vector<1x512x64xbf16> to vector<512x64xbf16>
    %c1 = arith.constant 1 : index
    %c0_7 = arith.constant 0 : index
    %c0_8 = arith.constant 0 : index
    %16 = vector.load %arg3[%c1, %c0_7, %c0_8] : memref<5x64x128xbf16, #tpu.memory_space<vmem>>, vector<1x64x128xbf16>
    %17 = vector.shape_cast %16 : vector<1x64x128xbf16> to vector<64x128xbf16>
    %cst_9 = arith.constant dense<0.000000e+00> : vector<512x128xf32>
    %18 = tpu.matmul %15, %17, %cst_9 {dimension_numbers = #tpu.dot_dimension_numbers<[1], [0], [0], [1], [0, 0, 1, 1], [], []>} : vector<512x64xbf16>, vector<64x128xbf16>, vector<512x128xf32> -> vector<512x128xf32>
    %19 = arith.addf %9, %18 : vector<512x128xf32>
    %c2_i32 = arith.constant 2 : i32
    %20 = arith.addi %0, %c2_i32 : i32
    %c64_i32_10 = arith.constant 64 : i32
    %21 = arith.muli %20, %c64_i32_10 : i32
    %22 = tpu.assume_multiple %21, 64 : i32
    %c0_11 = arith.constant 0 : index
    %23 = arith.index_cast %22 : i32 to index
    %c0_12 = arith.constant 0 : index
    %24 = vector.load %arg2[%c0_11, %23, %c0_12] : memref<1x768x64xbf16, #tpu.memory_space<vmem>>, vector<1x512x64xbf16>
    %25 = vector.shape_cast %24 : vector<1x512x64xbf16> to vector<512x64xbf16>
    %c2 = arith.constant 2 : index
    %c0_13 = arith.constant 0 : index
    %c0_14 = arith.constant 0 : index
    %26 = vector.load %arg3[%c2, %c0_13, %c0_14] : memref<5x64x128xbf16, #tpu.memory_space<vmem>>, vector<1x64x128xbf16>
    %27 = vector.shape_cast %26 : vector<1x64x128xbf16> to vector<64x128xbf16>
    %cst_15 = arith.constant dense<0.000000e+00> : vector<512x128xf32>
    %28 = tpu.matmul %25, %27, %cst_15 {dimension_numbers = #tpu.dot_dimension_numbers<[1], [0], [0], [1], [0, 0, 1, 1], [], []>} : vector<512x64xbf16>, vector<64x128xbf16>, vector<512x128xf32> -> vector<512x128xf32>
    %29 = arith.addf %19, %28 : vector<512x128xf32>
    %c3_i32 = arith.constant 3 : i32
    %30 = arith.addi %0, %c3_i32 : i32
    %c64_i32_16 = arith.constant 64 : i32
    %31 = arith.muli %30, %c64_i32_16 : i32
    %32 = tpu.assume_multiple %31, 64 : i32
    %c0_17 = arith.constant 0 : index
    %33 = arith.index_cast %32 : i32 to index
    %c0_18 = arith.constant 0 : index
    %34 = vector.load %arg2[%c0_17, %33, %c0_18] : memref<1x768x64xbf16, #tpu.memory_space<vmem>>, vector<1x512x64xbf16>
    %35 = vector.shape_cast %34 : vector<1x512x64xbf16> to vector<512x64xbf16>
    %c3 = arith.constant 3 : index
    %c0_19 = arith.constant 0 : index
    %c0_20 = arith.constant 0 : index
    %36 = vector.load %arg3[%c3, %c0_19, %c0_20] : memref<5x64x128xbf16, #tpu.memory_space<vmem>>, vector<1x64x128xbf16>
    %37 = vector.shape_cast %36 : vector<1x64x128xbf16> to vector<64x128xbf16>
    %cst_21 = arith.constant dense<0.000000e+00> : vector<512x128xf32>
    %38 = tpu.matmul %35, %37, %cst_21 {dimension_numbers = #tpu.dot_dimension_numbers<[1], [0], [0], [1], [0, 0, 1, 1], [], []>} : vector<512x64xbf16>, vector<64x128xbf16>, vector<512x128xf32> -> vector<512x128xf32>
    %39 = arith.addf %29, %38 : vector<512x128xf32>
    %c4_i32 = arith.constant 4 : i32
    %40 = arith.addi %0, %c4_i32 : i32
    %c64_i32_22 = arith.constant 64 : i32
    %41 = arith.muli %40, %c64_i32_22 : i32
    %42 = tpu.assume_multiple %41, 64 : i32
    %c0_23 = arith.constant 0 : index
    %43 = arith.index_cast %42 : i32 to index
    %c0_24 = arith.constant 0 : index
    %44 = vector.load %arg2[%c0_23, %43, %c0_24] : memref<1x768x64xbf16, #tpu.memory_space<vmem>>, vector<1x512x64xbf16>
    %45 = vector.shape_cast %44 : vector<1x512x64xbf16> to vector<512x64xbf16>
    %c4 = arith.constant 4 : index
    %c0_25 = arith.constant 0 : index
    %c0_26 = arith.constant 0 : index
    %46 = vector.load %arg3[%c4, %c0_25, %c0_26] : memref<5x64x128xbf16, #tpu.memory_space<vmem>>, vector<1x64x128xbf16>
    %47 = vector.shape_cast %46 : vector<1x64x128xbf16> to vector<64x128xbf16>
    %cst_27 = arith.constant dense<0.000000e+00> : vector<512x128xf32>
    %48 = tpu.matmul %45, %47, %cst_27 {dimension_numbers = #tpu.dot_dimension_numbers<[1], [0], [0], [1], [0, 0, 1, 1], [], []>} : vector<512x64xbf16>, vector<64x128xbf16>, vector<512x128xf32> -> vector<512x128xf32>
    %49 = arith.addf %39, %48 : vector<512x128xf32>
    %c0_28 = arith.constant 0 : index
    %c0_29 = arith.constant 0 : index
    %50 = vector.load %arg4[%c0_28, %c0_29] : memref<1x128xf32, #tpu.memory_space<vmem>>, vector<1x128xf32>
    %51 = vector.broadcast %50 : vector<1x128xf32> to vector<512x128xf32>
    %52 = arith.addf %49, %51 : vector<512x128xf32>
    %cst_30 = arith.constant 0.000000e+00 : f32
    %53 = vector.broadcast %cst_30 : f32 to vector<512x128xf32>
    %54 = arith.maximumf %52, %53 : vector<512x128xf32>
    %55 = tpu.transpose %54, [1, 0] : vector<512x128xf32> -> vector<128x512xf32>
    %56 = vector.extract_strided_slice %55 {offsets = [0, 0], sizes = [64, 512], strides = [1, 1]} : vector<128x512xf32> to vector<64x512xf32>
    %c0_31 = arith.constant 0 : index
    %c0_32 = arith.constant 0 : index
    %c0_33 = arith.constant 0 : index
    %57 = vector.load %arg5[%c0_31, %c0_32, %c0_33] : memref<1x64x512xf32, #tpu.memory_space<vmem>>, vector<1x64x512xf32>
    %58 = vector.shape_cast %57 : vector<1x64x512xf32> to vector<64x512xf32>
    %59 = vector.shape_cast %56 : vector<64x512xf32> to vector<1x64x512xf32>
    tpu.vector_store %arg5[%c0_31, %c0_32, %c0_33], %59 {strides = array<i32>} : memref<1x64x512xf32, #tpu.memory_space<vmem>>, vector<1x64x512xf32>,
    return
  }
  func.func @transform_0(%arg0: i32, %arg1: i32) -> (i32, i32, i32) {
    %c0_i32 = arith.constant 0 : i32
    %c0_i32_0 = arith.constant 0 : i32
    %c0_i32_1 = arith.constant 0 : i32
    return %arg0, %c0_i32, %c0_i32_0 : i32, i32, i32
  }
  func.func @transform_1(%arg0: i32, %arg1: i32) -> (i32, i32, i32) {
    %c0_i32 = arith.constant 0 : i32
    %c0_i32_0 = arith.constant 0 : i32
    %c0_i32_1 = arith.constant 0 : i32
    %c0_i32_2 = arith.constant 0 : i32
    return %c0_i32, %c0_i32_0, %c0_i32_1 : i32, i32, i32
  }
  func.func @transform_2(%arg0: i32, %arg1: i32) -> (i32, i32) {
    %c0_i32 = arith.constant 0 : i32
    %c0_i32_0 = arith.constant 0 : i32
    %c0_i32_1 = arith.constant 0 : i32
    return %c0_i32, %c0_i32_0 : i32, i32
  }
  func.func @transform_3(%arg0: i32, %arg1: i32) -> (i32, i32, i32) {
    %c0_i32 = arith.constant 0 : i32
    %c0_i32_0 = arith.constant 0 : i32
    return %arg0, %c0_i32, %arg1 : i32, i32, i32
  }
}

</mosaic_0001>

<bundles_post_ra>
// kernel: video_net_forward.1
= control target key start
LH: loop header
LB: loop body
LE: loop exit
PB: predicated region body
PF: predicated region fallthrough
CT: control target
= control target key end

     0   :  { %s5706_s12 = smov 0   ;;  %s5708_s13 = smov 0   ;;  %s6351_s0 = inlined_call_operand.vmem [shape: bf16[2,768,64], index: 0, kind: input, shape index: {}]   ;;  %s6352_s1 = inlined_call_operand.vmem [shape: bf16[5,64,128], index: 1, kind: input, shape index: {}]   ;;  %s6353_s2 = inlined_call_operand.vmem [shape: f32[1,128], index: 2, kind: input, shape index: {}]   ;;  %s6354_s3 = inlined_call_operand.vmem [shape: f32[2,64,512], index: 3, kind: output, shape index: {}]  }
   0x1   :  { %s5710_s14 = smov 0  }
   0x2 LB: > { %s25_s15 = sadd.s32 1, %s5680_s13  ;;  %p4017_p0 = scmp.ge.s32.totalorder %s5684_s14, 1  ;;  %s5684_s14 = sphi %s5710_s14, %s13_s14   ;;  %s5680_s13 = sphi %s5708_s13, %s6356_s13   ;;  %s5676_s12 = sphi %s5706_s12, %s6355_s12  }
   0x3   : > { %p27_p1 = scmp.ge.s32.totalorder %s25_s15, 2  ;;  %p151_p2 = scmp.lt.s32.totalorder %s5684_s14, 3 }
   0x5   : > { %s6358_s15 = smov (%p27_p1, %s25_s15), 0  ;;  %p152_p3 = pnand %p4017_p0, %p151_p2 }
   0x6   : > { %v5482_v0 = vld [vmem:[%s6352_s1 + $0x20] sm:$0xff] (!%p152_p3)   ;;  %p179_p4 = scmp.lt.s32.totalorder (!%p152_p3), %s5676_s12, 1  ;;  %v5484_v2 = vld [vmem:[%s6352_s1 + $0x28] sm:$0xff] (!%p152_p3)   ;;  %v5486_v4 = vld [vmem:[%s6352_s1 + $0x30] sm:$0xff] (!%p152_p3)   ;;  %vm536_vm0 = vcmask (!%p152_p3), 523264  }
   0x7   : > { %155 = sbr.rel (%p152_p3) target bundleno = 689 (0x2b1), region = 32  ;;  %v5730_v1 = vld [vmem:[%s6352_s1 + $0x40] sm:$0xff] (!%p152_p3)   ;;  %4833 = vmatprep.subr.bf16.mxu1 (!%p152_p3), %v5482_v0  ;;  %v5741_v3 = vld [vmem:[%s6352_s1 + $0x48] sm:$0xff] (!%p152_p3)   ;;  %v5752_v5 = vld [vmem:[%s6352_s1 + $0x50] sm:$0xff] (!%p152_p3)  }
   0x8   : > { %4977 = vmatprep.subr.bf16.mxu0 (!%p152_p3), %v5730_v1  ;;  %4834 = vmatpush3.bf16.msra.mxu1 (!%p152_p3), %v5482_v0  ;;  %v5488_v6 = vld [vmem:[%s6352_s1 + $0x38] sm:$0xff] (!%p152_p3)   ;;  %v5493_v10 = vld [vmem:[%s6352_s1] sm:$0xff] (!%p152_p3)   ;;  %v5504_v18 = vld [vmem:[%s6352_s1 + $0x68] sm:$0xff] (!%p152_p3)  }
   0x9   : > { %4978 = vmatpush3.bf16.msra.mxu0 (!%p152_p3), %v5730_v1  ;;  %4835 = vmatprep.subr.bf16.mxu1 (!%p152_p3), %v5484_v2  ;;  %v5765_v7 = vld [vmem:[%s6352_s1 + $0x58] sm:$0xff] (!%p152_p3)   ;;  %v5495_v11 = vld [vmem:[%s6352_s1 + $0x60] sm:$0xff] (!%p152_p3)   ;;  %v5512_v24 = vld [vmem:[%s6352_s1 + $0x8] sm:$0xff] (!%p152_p3)  }
   0xa   : > { %4979 = vmatprep.subr.bf16.mxu0 (!%p152_p3), %v5741_v3  ;;  %v5514_v26 = vld [vmem:[%s6352_s1 + $0x70] sm:$0xff] (!%p152_p3)   ;;  %v5523_v31 = vld [vmem:[%s6352_s1 + $0x78] sm:$0xff] (!%p152_p3)   ;;  %v5533_v37 = vld [vmem:[%s6352_s1 + $0x80] sm:$0xff] (!%p152_p3)  }
   0xb   : > { %v5531_v36 = vld [vmem:[%s6352_s1 + $0x10] sm:$0xff] (!%p152_p3)   ;;  %v5549_v46 = vld [vmem:[%s6352_s1 + $0x18] sm:$0xff] (!%p152_p3)   ;;  %v5551_v55 = vld [vmem:[%s6352_s1 + $0x88] sm:$0xff] (!%p152_p3)  }
   0xc   : > { %4836 = vmatpush3.bf16.msra.mxu1 (!%p152_p3), %v5484_v2  ;;  %v5568_v58 = vld [vmem:[%s6352_s1 + $0x90] sm:$0xff] (!%p152_p3)  }
   0xd   : > { %4980 = vmatpush3.bf16.msra.mxu0 (!%p152_p3), %v5741_v3  ;;  %4837 = vmatprep.subr.bf16.mxu1 (!%p152_p3), %v5486_v4 }
   0xe   : > { %s6360_s12 = smov (!%p179_p4, %s5676_s12), 1  ;;  %4981 = vmatprep.subr.bf16.mxu0 %v5752_v5 }
   0xf   : > { %s5457_s26 = smul.u32 384, %s6360_s12  ;;  %s4652_s16 = sshll.u32 %s6360_s12, 8 }
  0x10   : > { %4838 = vmatpush3.bf16.msra.mxu1 %v5486_v4  ;;  %s6302_s19 = scalar_lea.vmem %s6354_s3, %s4652_s16 }
  0x11   : > { %s5760_s6 = scalar_lea.vmem %s6351_s0, %s5457_s26  ;;  %4982 = vmatpush3.bf16.msra.mxu0 %v5752_v5  ;;  %4839 = vmatprep.subr.bf16.mxu1 %v5488_v6 }
  0x12   : > { %v5490_v8 = vld [vmem:[%s5760_s6 + $0x20] sm:$0xff]   ;;  %4983 = vmatprep.subr.bf16.mxu0 %v5765_v7  ;;  %v5492_v12 = vld [vmem:[%s5760_s6 + $0x28] sm:$0xff]   ;;  %v5496_v14 = vld [vmem:[%s5760_s6 + $0x30] sm:$0xff]  }
  0x13   : > { %v5491_v9 = vld [vmem:[%s5760_s6 + $0x40] sm:$0xff]   ;;  %4841 = vmatprep.mubr.msk.bf16.mxu1 %vm536_vm0, %v5490_v8  ;;  %v5494_v13 = vld [vmem:[%s5760_s6 + $0x48] sm:$0xff]   ;;  %v5497_v15 = vld [vmem:[%s5760_s6 + $0x50] sm:$0xff]  }
  0x14   : > { %4985 = vmatprep.mubr.msk.bf16.mxu0 %vm536_vm0, %v5491_v9  ;;  %4840 = vmatpush3.bf16.msra.mxu1 %v5488_v6  ;;  %v5498_v16 = vld [vmem:[%s5760_s6 + $0x38] sm:$0xff]   ;;  %v5500_v19 = vld [vmem:[%s5760_s6 + $0x40] sm:$0xff]   ;;  %v5502_v21 = vld [vmem:[%s5760_s6 + $0x48] sm:$0xff]  }
  0x15   : > { %4984 = vmatpush3.bf16.msra.mxu0 %v5765_v7  ;;  %4905 = vmatprep.subr.bf16.mxu1 %v5493_v10  ;;  %v5499_v17 = vld [vmem:[%s5760_s6 + $0x58] sm:$0xff]   ;;  %v5501_v20 = vld [vmem:[%s5760_s6 + $0x60] sm:$0xff]   ;;  %v5503_v22 = vld [vmem:[%s5760_s6 + $0x68] sm:$0xff]  }
  0x16   : > { %5049 = vmatprep.subr.bf16.mxu0 %v5495_v11  ;;  %v5505_v23 = vld [vmem:[%s5760_s6 + $0x50] sm:$0xff]   ;;  %v5507_v27 = vld [vmem:[%s5760_s6 + $0x58] sm:$0xff]   ;;  %v5509_v29 = vld [vmem:[%s5760_s6 + $0x60] sm:$0xff]  }
  0x17   : > { %4842 = vmatmul.mubr.msk.bf16.vlgmr.msra.gmra.mrb[0].mxu1 %vm536_vm0, %v5492_v12  ;;  %v5506_v25 = vld [vmem:[%s5760_s6 + $0x70] sm:$0xff]   ;;  %v5508_v28 = vld [vmem:[%s5760_s6 + $0x78] sm:$0xff]   ;;  %v5510_v30 = vld [vmem:[%s5760_s6 + $0x80] sm:$0xff]  }
  0x18   : > { %4986 = vmatmul.mubr.msk.bf16.vlgmr.msra.gmra.mrb[0].mxu0 %vm536_vm0, %v5494_v13  ;;  %4906 = vmatpush3.bf16.msra.mxu1 %v5493_v10  ;;  %v5511_v32 = vld [vmem:[%s5760_s6 + $0x68] sm:$0xff]   ;;  %v5515_v34 = vld [vmem:[%s5760_s6 + $0x70] sm:$0xff]   ;;  %v5517_v38 = vld [vmem:[%s5760_s6 + $0x78] sm:$0xff]  }
  0x19   : > { %5050 = vmatpush3.bf16.msra.mxu0 %v5495_v11  ;;  %4845 = vmatprep.mubr.msk.bf16.mxu1 %vm536_vm0, %v5496_v14  ;;  %v5513_v33 = vld [vmem:[%s5760_s6 + $0x88] sm:$0xff]   ;;  %v5516_v35 = vld [vmem:[%s5760_s6 + $0x90] sm:$0xff]   ;;  %v5518_v39 = vld [vmem:[%s5760_s6 + $0x98] sm:$0xff]  }
  0x1a   : > { %4989 = vmatprep.mubr.msk.bf16.mxu0 %vm536_vm0, %v5497_v15  ;;  %5051 = vmatprep.subr.bf16.mxu0 %v5504_v18  ;;  %v5519_v40 = vld [vmem:[%s5760_s6 + $0x80] sm:$0xff]   ;;  %v5521_v42 = vld [vmem:[%s5760_s6 + $0x88] sm:$0xff]   ;;  %v5524_v44 = vld [vmem:[%s5760_s6 + $0x90] sm:$0xff]  }
  0x1b   : > { %4907 = vmatprep.subr.bf16.mxu1 %v5512_v24  ;;  %v5520_v41 = vld [vmem:[%s5760_s6 + $0xa0] sm:$0xff]   ;;  %v5522_v43 = vld [vmem:[%s5760_s6 + $0xa8] sm:$0xff]   ;;  %v5525_v45 = vld [vmem:[%s5760_s6 + $0xb0] sm:$0xff]  }
  0x1c   : > { %4908 = vmatpush3.bf16.msra.mxu1 %v5512_v24  ;;  %v5526_v47 = vld [vmem:[%s5760_s6 + $0x98] sm:$0xff]   ;;  %v5528_v49 = vld [vmem:[%s5760_s6 + $0xa0] sm:$0xff]   ;;  %v5530_v51 = vld [vmem:[%s5760_s6 + $0xa8] sm:$0xff]  }
  0x1d   : > { %5052 = vmatpush3.bf16.msra.mxu0 %v5504_v18  ;;  %4909 = vmatprep.subr.bf16.mxu1 %v5531_v36  ;;  %v5527_v48 = vld [vmem:[%s5760_s6 + $0xb8] sm:$0xff]   ;;  %v5529_v50 = vld [vmem:[%s5760_s6 + $0x60] sm:$0xff]   ;;  %v5532_v52 = vld [vmem:[%s5760_s6 + $0x68] sm:$0xff]  }
  0x1e   : > { %5053 = vmatprep.subr.bf16.mxu0 %v5514_v26  ;;  %v5534_v53 = vld [vmem:[%s5760_s6 + $0xb0] sm:$0xff]   ;;  %v5536_v56 = vld [vmem:[%s5760_s6 + $0xb8] sm:$0xff]   ;;  %v5538_v59 = vld [vmem:[%s5760_s6 + $0xc0] sm:$0xff]  }
  0x1f   : > { %4846 = vmatmul.mubr.msk.bf16.gmra.mrb[4].mxu1 %vm536_vm0, %v5498_v16  ;;  %v5535_v54 = vld [vmem:[%s5760_s6 + $0x70] sm:$0xff]   ;;  %v5537_v57 = vld [vmem:[%s5760_s6 + $0x78] sm:$0xff]   ;;  %v5539_v60 = vld [vmem:[%s5760_s6 + $0x80] sm:$0xff]  }
  0x20   : > { %4990 = vmatmul.mubr.msk.bf16.gmra.mrb[4].mxu0 %vm536_vm0, %v5499_v17  ;;  %4849 = vmatprep.mubr.msk.bf16.mxu1 %vm536_vm0, %v5500_v19  ;;  %v5540_v61 = vld [vmem:[%s5760_s6 + $0xc8] sm:$0xff]   ;;  %v5542_v63 = vld [vmem:[%s5760_s6 + $0xd0] sm:$0xff]   ;;  %v5544_v2 = vld [vmem:[%s5760_s6 + $0xd8] sm:$0xff]  }
  0x21   : > { %4993 = vmatprep.mubr.msk.bf16.mxu0 %vm536_vm0, %v5501_v20  ;;  %5054 = vmatpush3.bf16.msra.mxu0 %v5514_v26  ;;  %v5541_v62 = vld [vmem:[%s5760_s6 + $0x88] sm:$0xff]   ;;  %v5543_v0 = vld [vmem:[%s5760_s6 + $0x90] sm:$0xff]   ;;  %v5545_v4 = vld [vmem:[%s5760_s6 + $0x98] sm:$0xff]  }
  0x22   : > { %5055 = vmatprep.subr.bf16.mxu0 %v5523_v31  ;;  %4910 = vmatpush3.bf16.msra.mxu1 %v5531_v36  ;;  %v5546_v6 = vld [vmem:[%s5760_s6 + $0xe0] sm:$0xff]   ;;  %v5585_v8 = vld [vmem:[%s6352_s1 + $0x98] sm:$0xff]   ;;  %v5548_v10 = vld [vmem:[%s5760_s6 + $0xe8] sm:$0xff]  }
  0x23   : > { %4911 = vmatprep.subr.bf16.mxu1 %v5549_v46  ;;  %v5547_v9 = vld [vmem:[%s5760_s6 + $0xa0] sm:$0xff]   ;;  %v5550_v11 = vld [vmem:[%s5760_s6 + $0xa8] sm:$0xff]   ;;  %v5552_v12 = vld [vmem:[%s5760_s6 + $0xf0] sm:$0xff]  }
  0x24   : > { %v5553_v13 = vld [vmem:[%s5760_s6 + $0xb0] sm:$0xff]   ;;  %v5554_v14 = vld [vmem:[%s5760_s6 + $0xf8] sm:$0xff]   ;;  %v5556_v16 = vld [vmem:[%s5760_s6 + $0x100] sm:$0xff]  }
  0x25   : > { %5056 = vmatpush3.bf16.msra.mxu0 %v5523_v31  ;;  %v5555_v15 = vld [vmem:[%s5760_s6 + $0xb8] sm:$0xff]   ;;  %v5557_v17 = vld [vmem:[%s5760_s6 + $0xc0] sm:$0xff]   ;;  %v5558_v18 = vld [vmem:[%s5760_s6 + $0x108] sm:$0xff]  }
  0x26   : > { %5121 = vmatprep.subr.bf16.mxu0 %v5533_v37  ;;  %4912 = vmatpush3.bf16.msra.mxu1 %v5549_v46  ;;  %v5559_v19 = vld [vmem:[%s5760_s6 + $0xc8] sm:$0xff]   ;;  %v5560_v20 = vld [vmem:[%s5760_s6 + $0x110] sm:$0xff]   ;;  %v5564_v24 = vld [vmem:[%s5760_s6] sm:$0xff]  }
  0x27   : > { %4850 = vmatmul.mubr.msk.bf16.gmra.mrb[8].mxu1 %vm536_vm0, %v5502_v21  ;;  %5193 = vmatprep.subr.bf16.mxu1 %v5730_v1  ;;  %v5561_v21 = vld [vmem:[%s5760_s6 + $0xd0] sm:$0xff]   ;;  %v5566_v26 = vld [vmem:[%s5760_s6 + $0x8] sm:$0xff]   ;;  %v5572_v31 = vld [vmem:[%s5760_s6 + $0xf8] sm:$0xff]  }
  0x28   : > { %4994 = vmatmul.mubr.msk.bf16.gmra.mrb[8].mxu0 %vm536_vm0, %v5503_v22  ;;  %4853 = vmatprep.mubr.msk.bf16.mxu1 %vm536_vm0, %v5505_v23  ;;  %v5562_v22 = vld [vmem:[%s5760_s6 + $0x118] sm:$0xff]   ;;  %v5592_v46 = vld [vmem:[%s5760_s6 + $0x68] sm:$0xff]  }
  0x29   : > { %4997 = vmatprep.mubr.msk.bf16.mxu0 %vm536_vm0, %v5506_v25  ;;  %v5563_v23 = vld [vmem:[%s5760_s6 + $0xd8] sm:$0xff]   ;;  %v5565_v25 = vld [vmem:[%s5760_s6 + $0xe0] sm:$0xff]  }
  0x2a   : > { %v5580_v36 = vld [vmem:[%s5760_s6 + $0x118] sm:$0xff]  }
  0x2f   : > { %4854 = vmatmul.mubr.msk.bf16.gmra.mrb[12].mxu1 %vm536_vm0, %v5507_v27  ;;  %v5567_v27 = vld [vmem:[%s5760_s6 + $0xe8] sm:$0xff]  }
  0x30   : > { %4998 = vmatmul.mubr.msk.bf16.gmra.mrb[12].mxu0 %vm536_vm0, %v5508_v28  ;;  %4857 = vmatprep.mubr.msk.bf16.mxu1 %vm536_vm0, %v5509_v29  ;;  %v5569_v28 = vld [vmem:[%s5760_s6 + $0x10] sm:$0xff]  }
  0x31   : > { %5001 = vmatprep.mubr.msk.bf16.mxu0 %vm536_vm0, %v5510_v30  ;;  %v5570_v29 = vld [vmem:[%s5760_s6 + $0xf0] sm:$0xff]   ;;  %v5571_v30 = vld [vmem:[%s5760_s6 + $0x18] sm:$0xff]  }
  0x37   : > { %4858 = vmatmul.mubr.msk.bf16.gmra.mrb[16].mxu1 %vm536_vm0, %v5511_v32  ;;  %v5573_v32 = vld [vmem:[%s5760_s6 + $0x20] sm:$0xff]  }
  0x38   : > { %5002 = vmatmul.mubr.msk.bf16.gmra.mrb[16].mxu0 %vm536_vm0, %v5513_v33  ;;  %4861 = vmatprep.mubr.msk.bf16.mxu1 %vm536_vm0, %v5515_v34  ;;  %v5574_v33 = vld [vmem:[%s5760_s6 + $0x100] sm:$0xff]   ;;  %v5576_v34 = vld [vmem:[%s5760_s6 + $0x108] sm:$0xff]  }
  0x39   : > { %5005 = vmatprep.mubr.msk.bf16.mxu0 %vm536_vm0, %v5516_v35  ;;  %v5578_v35 = vld [vmem:[%s5760_s6 + $0x110] sm:$0xff]  }
  0x3f   : > { %4862 = vmatmul.mubr.msk.bf16.gmra.mrb[20].mxu1 %vm536_vm0, %v5517_v38  ;;  %v5582_v38 = vld [vmem:[%s5760_s6 + $0x120] sm:$0xff]  }
  0x40   : > { %5006 = vmatmul.mubr.msk.bf16.gmra.mrb[20].mxu0 %vm536_vm0, %v5518_v39  ;;  %4865 = vmatprep.mubr.msk.bf16.mxu1 %vm536_vm0, %v5519_v40  ;;  %v5584_v39 = vld [vmem:[%s5760_s6 + $0x128] sm:$0xff]   ;;  %v5586_v40 = vld [vmem:[%s5760_s6 + $0x50] sm:$0xff]  }
  0x41   : > { %5009 = vmatprep.mubr.msk.bf16.mxu0 %vm536_vm0, %v5520_v41  ;;  %v5587_v41 = vld [vmem:[%s5760_s6 + $0x130] sm:$0xff]  }
  0x47   : > { %4866 = vmatmul.mubr.msk.bf16.gmra.mrb[24].mxu1 %vm536_vm0, %v5521_v42  ;;  %v5588_v42 = vld [vmem:[%s5760_s6 + $0x58] sm:$0xff]  }
  0x48   : > { %5010 = vmatmul.mubr.msk.bf16.gmra.mrb[24].mxu0 %vm536_vm0, %v5522_v43  ;;  %4869 = vmatprep.mubr.msk.bf16.mxu1 %vm536_vm0, %v5524_v44  ;;  %v5589_v43 = vld [vmem:[%s5760_s6 + $0x138] sm:$0xff]   ;;  %v5590_v44 = vld [vmem:[%s5760_s6 + $0x60] sm:$0xff]  }
  0x49   : > { %5013 = vmatprep.mubr.msk.bf16.mxu0 %vm536_vm0, %v5525_v45  ;;  %v5591_v45 = vld [vmem:[%s5760_s6 + $0x140] sm:$0xff]  }
  0x4f   : > { %4870 = vmatmul.mubr.msk.bf16.gmra.mrb[28].mxu1 %vm536_vm0, %v5526_v47  ;;  %v5593_v47 = vld [vmem:[%s5760_s6 + $0x148] sm:$0xff]  }
  0x50   : > { %5014 = vmatmul.mubr.msk.bf16.gmra.mrb[28].mxu0 %vm536_vm0, %v5527_v48  ;;  %4873 = vmatprep.mubr.msk.bf16.mxu1 %vm536_vm0, %v5528_v49  ;;  %v5594_v48 = vld [vmem:[%s5760_s6 + $0x70] sm:$0xff]  }
  0x51   : > { %5057 = vmatprep.mubr.msk.bf16.mxu0 %vm536_vm0, %v5529_v50  ;;  %v5595_v49 = vld [vmem:[%s5760_s6 + $0x150] sm:$0xff]   ;;  %v5596_v50 = vld [vmem:[%s5760_s6 + $0x78] sm:$0xff]  }
  0x57   : > { %4874 = vmatmul.mubr.msk.bf16.gmra.mrb[32].mxu1 %vm536_vm0, %v5530_v51  ;;  %v5597_v51 = vld [vmem:[%s5760_s6 + $0x158] sm:$0xff]  }
  0x58   : > { %5058 = vmatmul.mubr.msk.bf16.vlgmr.msra.gmra.mrb[0].mxu0 %vm536_vm0, %v5532_v52  ;;  %4877 = vmatprep.mubr.msk.bf16.mxu1 %vm536_vm0, %v5534_v53  ;;  %v5598_v52 = vld [vmem:[%s5760_s6 + $0x80] sm:$0xff]  }
  0x59   : > { %5122 = vmatpush3.bf16.msra.mxu0 %v5533_v37  ;;  %5061 = vmatprep.mubr.msk.bf16.mxu0 %vm536_vm0, %v5535_v54  ;;  %v5581_v37 = vld [vmem:[%s5760_s6 + $0x40] sm:$0xff]   ;;  %v5600_v54 = vld [vmem:[%s5760_s6 + $0x88] sm:$0xff]  }
  0x5a   : > { %5123 = vmatprep.subr.bf16.mxu0 %v5551_v55  ;;  %v5599_v53 = vld [vmem:[%s5760_s6 + $0x80] sm:$0xff]  }
  0x5d   : > { %5124 = vmatpush3.bf16.msra.mxu0 %v5551_v55  ;;  %v5601_v55 = vld [vmem:[%s5760_s6 + $0x88] sm:$0xff]  }
  0x5e   : > { %5125 = vmatprep.subr.bf16.mxu0 %v5568_v58 }
  0x5f   : > { %4878 = vmatmul.mubr.msk.bf16.gmra.mrb[36].mxu1 %vm536_vm0, %v5536_v56  ;;  %v5602_v56 = vld [vmem:[%s5760_s6 + $0x90] sm:$0xff]  }
  0x60   : > { %5062 = vmatmul.mubr.msk.bf16.gmra.mrb[4].mxu0 %vm536_vm0, %v5537_v57  ;;  %4881 = vmatprep.mubr.msk.bf16.mxu1 %vm536_vm0, %v5538_v59  ;;  %v5603_v57 = vld [vmem:[%s5760_s6 + $0x90] sm:$0xff]   ;;  %v5605_v59 = vld [vmem:[%s5760_s6 + $0x98] sm:$0xff]  }
  0x61   : > { %5065 = vmatprep.mubr.msk.bf16.mxu0 %vm536_vm0, %v5539_v60  ;;  %5126 = vmatpush3.bf16.msra.mxu0 %v5568_v58  ;;  %v5604_v58 = vld [vmem:[%s5760_s6 + $0x98] sm:$0xff]   ;;  %v5606_v60 = vld [vmem:[%s5760_s6 + $0xa0] sm:$0xff]  }
  0x62   : > { %5127 = vmatprep.subr.bf16.mxu0 %v5585_v8 }
  0x65   : > { %5128 = vmatpush3.bf16.msra.mxu0 %v5585_v8  ;;  %v5614_v8 = vld [vmem:[%s5760_s6 + $0xc0] sm:$0xff]  }
  0x67   : > { %4882 = vmatmul.mubr.msk.bf16.gmra.mrb[40].mxu1 %vm536_vm0, %v5540_v61  ;;  %v5607_v61 = vld [vmem:[%s5760_s6 + $0xa0] sm:$0xff]  }
  0x68   : > { %5066 = vmatmul.mubr.msk.bf16.gmra.mrb[8].mxu0 %vm536_vm0, %v5541_v62  ;;  %4885 = vmatprep.mubr.msk.bf16.mxu1 %vm536_vm0, %v5542_v63  ;;  %v5608_v62 = vld [vmem:[%s5760_s6 + $0xa8] sm:$0xff]  }
  0x69   : > { %5069 = vmatprep.mubr.msk.bf16.mxu0 %vm536_vm0, %v5543_v0  ;;  %v5609_v63 = vld [vmem:[%s5760_s6 + $0xa8] sm:$0xff]   ;;  %v5610_v0 = vld [vmem:[%s5760_s6 + $0xb0] sm:$0xff]  }
  0x6f   : > { %4886 = vmatmul.mubr.msk.bf16.gmra.mrb[44].mxu1 %vm536_vm0, %v5544_v2  ;;  %v5611_v2 = vld [vmem:[%s5760_s6 + $0xb0] sm:$0xff]  }
  0x70   : > { %5070 = vmatmul.mubr.msk.bf16.gmra.mrb[12].mxu0 %vm536_vm0, %v5545_v4  ;;  %4889 = vmatprep.mubr.msk.bf16.mxu1 %vm536_vm0, %v5546_v6  ;;  %v5612_v4 = vld [vmem:[%s5760_s6 + $0xb8] sm:$0xff]  }
  0x71   : > { %5073 = vmatprep.mubr.msk.bf16.mxu0 %vm536_vm0, %v5547_v9  ;;  %v5613_v6 = vld [vmem:[%s5760_s6 + $0xb8] sm:$0xff]   ;;  %v5615_v9 = vld [vmem:[%s5760_s6 + $0xc0] sm:$0xff]  }
  0x77   : > { %4890 = vmatmul.mubr.msk.bf16.gmra.mrb[48].mxu1 %vm536_vm0, %v5548_v10  ;;  %v5616_v10 = vld [vmem:[%s5760_s6 + $0xc8] sm:$0xff]  }
  0x78   : > { %5074 = vmatmul.mubr.msk.bf16.gmra.mrb[16].mxu0 %vm536_vm0, %v5550_v11  ;;  %4893 = vmatprep.mubr.msk.bf16.mxu1 %vm536_vm0, %v5552_v12  ;;  %v5617_v11 = vld [vmem:[%s5760_s6 + $0xc8] sm:$0xff]   ;;  %v5618_v12 = vld [vmem:[%s5760_s6 + $0xd0] sm:$0xff]  }
  0x79   : > { %5077 = vmatprep.mubr.msk.bf16.mxu0 %vm536_vm0, %v5553_v13  ;;  %v5619_v13 = vld [vmem:[%s5760_s6 + $0xd0] sm:$0xff]  }
  0x7f   : > { %4894 = vmatmul.mubr.msk.bf16.gmra.mrb[52].mxu1 %vm536_vm0, %v5554_v14  ;;  %v5620_v14 = vld [vmem:[%s5760_s6 + $0xd8] sm:$0xff]  }
  0x80   : > { %5078 = vmatmul.mubr.msk.bf16.gmra.mrb[20].mxu0 %vm536_vm0, %v5555_v15  ;;  %4897 = vmatprep.mubr.msk.bf16.mxu1 %vm536_vm0, %v5556_v16  ;;  %v5621_v15 = vld [vmem:[%s5760_s6 + $0xd8] sm:$0xff]   ;;  %v5622_v16 = vld [vmem:[%s5760_s6 + $0xe0] sm:$0xff]  }
  0x81   : > { %5081 = vmatprep.mubr.msk.bf16.mxu0 %vm536_vm0, %v5557_v17  ;;  %v5623_v17 = vld [vmem:[%s5760_s6 + $0xe0] sm:$0xff]  }
  0x87   : > { %4898 = vmatmul.mubr.msk.bf16.gmra.mrb[56].mxu1 %vm536_vm0, %v5558_v18  ;;  %v5624_v18 = vld [vmem:[%s5760_s6 + $0xe8] sm:$0xff]  }
  0x88   : > { %5082 = vmatmul.mubr.msk.bf16.gmra.mrb[24].mxu0 %vm536_vm0, %v5559_v19  ;;  %4901 = vmatprep.mubr.msk.bf16.mxu1 %vm536_vm0, %v5560_v20  ;;  %v5625_v19 = vld [vmem:[%s5760_s6 + $0xe8] sm:$0xff]   ;;  %v5626_v20 = vld [vmem:[%s5760_s6 + $0xf0] sm:$0xff]  }
  0x89   : > { %5085 = vmatprep.mubr.msk.bf16.mxu0 %vm536_vm0, %v5561_v21  ;;  %v5627_v21 = vld [vmem:[%s5760_s6 + $0xf0] sm:$0xff]  }
  0x8f   : > { %4902 = vmatmul.mubr.msk.bf16.gmra.mrb[60].mxu1 %vm536_vm0, %v5562_v22  ;;  %v5628_v22 = vld [vmem:[%s5760_s6 + $0xf8] sm:$0xff]  }
  0x90   : > { %5086 = vmatmul.mubr.msk.bf16.gmra.mrb[28].mxu0 %vm536_vm0, %v5563_v23  ;;  %4913 = vmatprep.mubr.msk.bf16.mxu1 %vm536_vm0, %v5564_v24  ;;  %v5629_v23 = vld [vmem:[%s5760_s6 + $0xf8] sm:$0xff]   ;;  %v5630_v24 = vld [vmem:[%s5760_s6 + $0xc0] sm:$0xff]  }
  0x91   : > { %5089 = vmatprep.mubr.msk.bf16.mxu0 %vm536_vm0, %v5565_v25  ;;  %v5631_v25 = vld [vmem:[%s5760_s6 + $0x100] sm:$0xff]  }
  0x97   : > { %4914 = vmatmul.mubr.msk.bf16.vlgmr.msra.gmra.mrb[0].mxu1 %vm536_vm0, %v5566_v26  ;;  %v5632_v26 = vld [vmem:[%s5760_s6 + $0xc8] sm:$0xff]  }
  0x98   : > { %5090 = vmatmul.mubr.msk.bf16.gmra.mrb[32].mxu0 %vm536_vm0, %v5567_v27  ;;  %5197 = vmatpush3.bf16.msra.mxu1 %v5730_v1  ;;  %v5575_v1 = vld [vmem:[%s5760_s6 + $0x28] sm:$0xff]  }
  0x99   : > { %4917 = vmatprep.mubr.msk.bf16.mxu1 %vm536_vm0, %v5569_v28  ;;  %5093 = vmatprep.mubr.msk.bf16.mxu0 %vm536_vm0, %v5570_v29  ;;  %v5633_v27 = vld [vmem:[%s5760_s6 + $0x108] sm:$0xff]   ;;  %v5634_v28 = vld [vmem:[%s5760_s6 + $0xd0] sm:$0xff]  }
  0x9a   : > { %5194 = vmatprep.subr.bf16.mxu1 %v5741_v3  ;;  %v5635_v29 = vld [vmem:[%s5760_s6 + $0x110] sm:$0xff]  }
  0x9c   : > { %5198 = vmatpush3.bf16.msra.mxu1 %v5741_v3  ;;  %v5577_v3 = vld [vmem:[%s5760_s6 + $0x30] sm:$0xff]  }
  0x9d   : > { %5195 = vmatprep.subr.bf16.mxu1 %v5752_v5 }
  0x9f   : > { %4918 = vmatmul.mubr.msk.bf16.gmra.mrb[4].mxu1 %vm536_vm0, %v5571_v30  ;;  %v5636_v30 = vld [vmem:[%s5760_s6 + $0xd8] sm:$0xff]  }
  0xa0   : > { %5094 = vmatmul.mubr.msk.bf16.gmra.mrb[36].mxu0 %vm536_vm0, %v5572_v31  ;;  %4921 = vmatprep.mubr.msk.bf16.mxu1 %vm536_vm0, %v5573_v32  ;;  %v5637_v31 = vld [vmem:[%s5760_s6 + $0x118] sm:$0xff]   ;;  %v5638_v32 = vld [vmem:[%s5760_s6 + $0xe0] sm:$0xff]  }
  0xa1   : > { %5097 = vmatprep.mubr.msk.bf16.mxu0 %vm536_vm0, %v5574_v33  ;;  %5199 = vmatpush3.bf16.msra.mxu1 %v5752_v5  ;;  %v5579_v5 = vld [vmem:[%s5760_s6 + $0x38] sm:$0xff]   ;;  %v5639_v33 = vld [vmem:[%s5760_s6 + $0x120] sm:$0xff]  }
  0xa2   : > { %5196 = vmatprep.subr.bf16.mxu1 %v5765_v7 }
  0xa5   : > { %5200 = vmatpush3.bf16.msra.mxu1 %v5765_v7  ;;  %v5583_v7 = vld [vmem:[%s5760_s6 + $0x48] sm:$0xff]  }
  0xa7   : > { %4922 = vmatmul.mubr.msk.bf16.gmra.mrb[8].mxu1 %vm536_vm0, %v5575_v1  ;;  %v5640_v1 = vld [vmem:[%s5760_s6 + $0xe8] sm:$0xff]  }
  0xa8   : > { %5098 = vmatmul.mubr.msk.bf16.gmra.mrb[40].mxu0 %vm536_vm0, %v5576_v34  ;;  %4925 = vmatprep.mubr.msk.bf16.mxu1 %vm536_vm0, %v5577_v3  ;;  %v5641_v34 = vld [vmem:[%s5760_s6 + $0x128] sm:$0xff]   ;;  %v5642_v3 = vld [vmem:[%s5760_s6 + $0xf0] sm:$0xff]  }
  0xa9   : > { %5101 = vmatprep.mubr.msk.bf16.mxu0 %vm536_vm0, %v5578_v35  ;;  %v5643_v35 = vld [vmem:[%s5760_s6 + $0x130] sm:$0xff]  }
  0xaf   : > { %4926 = vmatmul.mubr.msk.bf16.gmra.mrb[12].mxu1 %vm536_vm0, %v5579_v5  ;;  %v5644_v5 = vld [vmem:[%s5760_s6 + $0xf8] sm:$0xff]  }
  0xb0   : > { %5102 = vmatmul.mubr.msk.bf16.gmra.mrb[44].mxu0 %vm536_vm0, %v5580_v36  ;;  %4929 = vmatprep.mubr.msk.bf16.mxu1 %vm536_vm0, %v5581_v37  ;;  %v5645_v36 = vld [vmem:[%s5760_s6 + $0x138] sm:$0xff]   ;;  %v5646_v37 = vld [vmem:[%s5760_s6 + $0x100] sm:$0xff]  }
  0xb1   : > { %5105 = vmatprep.mubr.msk.bf16.mxu0 %vm536_vm0, %v5582_v38  ;;  %v5647_v38 = vld [vmem:[%s5760_s6 + $0x140] sm:$0xff]  }
  0xb7   : > { %4930 = vmatmul.mubr.msk.bf16.gmra.mrb[16].mxu1 %vm536_vm0, %v5583_v7  ;;  %v5648_v7 = vld [vmem:[%s5760_s6 + $0x108] sm:$0xff]  }
  0xb8   : > { %5106 = vmatmul.mubr.msk.bf16.gmra.mrb[48].mxu0 %vm536_vm0, %v5584_v39  ;;  %4933 = vmatprep.mubr.msk.bf16.mxu1 %vm536_vm0, %v5586_v40  ;;  %v5649_v39 = vld [vmem:[%s5760_s6 + $0x148] sm:$0xff]   ;;  %v5650_v40 = vld [vmem:[%s5760_s6 + $0x110] sm:$0xff]  }
  0xb9   : > { %5109 = vmatprep.mubr.msk.bf16.mxu0 %vm536_vm0, %v5587_v41  ;;  %v5651_v41 = vld [vmem:[%s5760_s6 + $0x150] sm:$0xff]  }
  0xbf   : > { %4934 = vmatmul.mubr.msk.bf16.gmra.mrb[20].mxu1 %vm536_vm0, %v5588_v42  ;;  %v5652_v42 = vld [vmem:[%s5760_s6 + $0x118] sm:$0xff]  }
  0xc0   : > { %5110 = vmatmul.mubr.msk.bf16.gmra.mrb[52].mxu0 %vm536_vm0, %v5589_v43  ;;  %4937 = vmatprep.mubr.msk.bf16.mxu1 %vm536_vm0, %v5590_v44  ;;  %v5653_v43 = vld [vmem:[%s5760_s6 + $0x158] sm:$0xff]   ;;  %v5654_v44 = vld [vmem:[%s5760_s6 + $0x120] sm:$0xff]  }
  0xc1   : > { %5113 = vmatprep.mubr.msk.bf16.mxu0 %vm536_vm0, %v5591_v45  ;;  %v5655_v45 = vld [vmem:[%s5760_s6 + $0x160] sm:$0xff]  }
  0xc7   : > { %4938 = vmatmul.mubr.msk.bf16.gmra.mrb[24].mxu1 %vm536_vm0, %v5592_v46  ;;  %v5656_v46 = vld [vmem:[%s5760_s6 + $0x128] sm:$0xff]  }
  0xc8   : > { %5114 = vmatmul.mubr.msk.bf16.gmra.mrb[56].mxu0 %vm536_vm0, %v5593_v47  ;;  %4941 = vmatprep.mubr.msk.bf16.mxu1 %vm536_vm0, %v5594_v48  ;;  %v5657_v47 = vld [vmem:[%s5760_s6 + $0x168] sm:$0xff]   ;;  %v5658_v48 = vld [vmem:[%s5760_s6 + $0x130] sm:$0xff]  }
  0xc9   : > { %5117 = vmatprep.mubr.msk.bf16.mxu0 %vm536_vm0, %v5595_v49  ;;  %v5659_v49 = vld [vmem:[%s5760_s6 + $0x170] sm:$0xff]  }
  0xcf   : > { %4942 = vmatmul.mubr.msk.bf16.gmra.mrb[28].mxu1 %vm536_vm0, %v5596_v50  ;;  %v5660_v50 = vld [vmem:[%s5760_s6 + $0x138] sm:$0xff]  }
  0xd0   : > { %5118 = vmatmul.mubr.msk.bf16.gmra.mrb[60].mxu0 %vm536_vm0, %v5597_v51  ;;  %4945 = vmatprep.mubr.msk.bf16.mxu1 %vm536_vm0, %v5598_v52  ;;  %v5661_v51 = vld [vmem:[%s5760_s6 + $0x178] sm:$0xff]  }
  0xd1   : > { %5129 = vmatprep.mubr.msk.bf16.mxu0 %vm536_vm0, %v5599_v53 }
  0xd7   : > { %4946 = vmatmul.mubr.msk.bf16.gmra.mrb[32].mxu1 %vm536_vm0, %v5600_v54 }
  0xd8   : > { %5130 = vmatmul.mubr.msk.bf16.vlgmr.msra.gmra.mrb[0].mxu0 %vm536_vm0, %v5601_v55  ;;  %4949 = vmatprep.mubr.msk.bf16.mxu1 %vm536_vm0, %v5602_v56 }
  0xd9   : > { %5133 = vmatprep.mubr.msk.bf16.mxu0 %vm536_vm0, %v5603_v57 }
  0xdf   : > { %4950 = vmatmul.mubr.msk.bf16.gmra.mrb[36].mxu1 %vm536_vm0, %v5604_v58 }
  0xe0   : > { %5134 = vmatmul.mubr.msk.bf16.gmra.mrb[4].mxu0 %vm536_vm0, %v5605_v59  ;;  %4953 = vmatprep.mubr.msk.bf16.mxu1 %vm536_vm0, %v5606_v60 }
  0xe1   : > { %5137 = vmatprep.mubr.msk.bf16.mxu0 %vm536_vm0, %v5607_v61 }
  0xe7   : > { %4954 = vmatmul.mubr.msk.bf16.gmra.mrb[40].mxu1 %vm536_vm0, %v5608_v62 }
  0xe8   : > { %5138 = vmatmul.mubr.msk.bf16.gmra.mrb[8].mxu0 %vm536_vm0, %v5609_v63  ;;  %4957 = vmatprep.mubr.msk.bf16.mxu1 %vm536_vm0, %v5610_v0 }
  0xe9   : > { %5141 = vmatprep.mubr.msk.bf16.mxu0 %vm536_vm0, %v5611_v2 }
  0xef   : > { %4958 = vmatmul.mubr.msk.bf16.gmra.mrb[44].mxu1 %vm536_vm0, %v5612_v4 }
  0xf0   : > { %5142 = vmatmul.mubr.msk.bf16.gmra.mrb[12].mxu0 %vm536_vm0, %v5613_v6  ;;  %4961 = vmatprep.mubr.msk.bf16.mxu1 %vm536_vm0, %v5614_v8 }
  0xf1   : > { %5145 = vmatprep.mubr.msk.bf16.mxu0 %vm536_vm0, %v5615_v9 }
  0xf7   : > { %4962 = vmatmul.mubr.msk.bf16.gmra.mrb[48].mxu1 %vm536_vm0, %v5616_v10 }
  0xf8   : > { %5146 = vmatmul.mubr.msk.bf16.gmra.mrb[16].mxu0 %vm536_vm0, %v5617_v11  ;;  %4965 = vmatprep.mubr.msk.bf16.mxu1 %vm536_vm0, %v5618_v12 }
  0xf9   : > { %5149 = vmatprep.mubr.msk.bf16.mxu0 %vm536_vm0, %v5619_v13 }
  0xff   : > { %4966 = vmatmul.mubr.msk.bf16.gmra.mrb[52].mxu1 %vm536_vm0, %v5620_v14 }
 0x100   : > { %5150 = vmatmul.mubr.msk.bf16.gmra.mrb[20].mxu0 %vm536_vm0, %v5621_v15  ;;  %4969 = vmatprep.mubr.msk.bf16.mxu1 %vm536_vm0, %v5622_v16 }
 0x101   : > { %5153 = vmatprep.mubr.msk.bf16.mxu0 %vm536_vm0, %v5623_v17 }
 0x107   : > { %4970 = vmatmul.mubr.msk.bf16.gmra.mrb[56].mxu1 %vm536_vm0, %v5624_v18 }
 0x108   : > { %5154 = vmatmul.mubr.msk.bf16.gmra.mrb[24].mxu0 %vm536_vm0, %v5625_v19  ;;  %4973 = vmatprep.mubr.msk.bf16.mxu1 %vm536_vm0, %v5626_v20 }
 0x109   : > { %5157 = vmatprep.mubr.msk.bf16.mxu0 %vm536_vm0, %v5627_v21 }
 0x10f   : > { %4974 = vmatmul.mubr.msk.bf16.gmra.mrb[60].mxu1 %vm536_vm0, %v5628_v22 }
 0x110   : > { %5158 = vmatmul.mubr.msk.bf16.gmra.mrb[28].mxu0 %vm536_vm0, %v5629_v23  ;;  %5017 = vmatprep.mubr.msk.bf16.mxu1 %vm536_vm0, %v5630_v24 }
 0x111   : > { %5161 = vmatprep.mubr.msk.bf16.mxu0 %vm536_vm0, %v5631_v25 }
 0x117   : > { %5018 = vmatmul.mubr.msk.bf16.vlgmr.msra.gmra.mrb[32].mxu1 %vm536_vm0, %v5632_v26 }
 0x118   : > { %5162 = vmatmul.mubr.msk.bf16.gmra.mrb[32].mxu0 %vm536_vm0, %v5633_v27  ;;  %5021 = vmatprep.mubr.msk.bf16.mxu1 %vm536_vm0, %v5634_v28  ;;  %v6177_v27 = vld [vmem:[%s6353_s2] ss:$0 sm:$0xff] }
 0x119   : > { %5165 = vmatprep.mubr.msk.bf16.mxu0 %vm536_vm0, %v5635_v29 }
 0x11f   : > { %5022 = vmatmul.mubr.msk.bf16.gmra.mrb[36].mxu1 %vm536_vm0, %v5636_v30 }
 0x120   : > { %5166 = vmatmul.mubr.msk.bf16.gmra.mrb[36].mxu0 %vm536_vm0, %v5637_v31  ;;  %5025 = vmatprep.mubr.msk.bf16.mxu1 %vm536_vm0, %v5638_v32 }
 0x121   : > { %5169 = vmatprep.mubr.msk.bf16.mxu0 %vm536_vm0, %v5639_v33 }
 0x127   : > { %5026 = vmatmul.mubr.msk.bf16.gmra.mrb[40].mxu1 %vm536_vm0, %v5640_v1 }
 0x128   : > { %5170 = vmatmul.mubr.msk.bf16.gmra.mrb[40].mxu0 %vm536_vm0, %v5641_v34  ;;  %5029 = vmatprep.mubr.msk.bf16.mxu1 %vm536_vm0, %v5642_v3 }
 0x129   : > { %5173 = vmatprep.mubr.msk.bf16.mxu0 %vm536_vm0, %v5643_v35 }
 0x12f   : > { %5030 = vmatmul.mubr.msk.bf16.gmra.mrb[44].mxu1 %vm536_vm0, %v5644_v5 }
 0x130   : > { %5174 = vmatmul.mubr.msk.bf16.gmra.mrb[44].mxu0 %vm536_vm0, %v5645_v36  ;;  %5033 = vmatprep.mubr.msk.bf16.mxu1 %vm536_vm0, %v5646_v37 }
 0x131   : > { %5177 = vmatprep.mubr.msk.bf16.mxu0 %vm536_vm0, %v5647_v38 }
 0x137   : > { %5034 = vmatmul.mubr.msk.bf16.gmra.mrb[48].mxu1 %vm536_vm0, %v5648_v7 }
 0x138   : > { %5178 = vmatmul.mubr.msk.bf16.gmra.mrb[48].mxu0 %vm536_vm0, %v5649_v39  ;;  %5037 = vmatprep.mubr.msk.bf16.mxu1 %vm536_vm0, %v5650_v40 }
 0x139   : > { %5181 = vmatprep.mubr.msk.bf16.mxu0 %vm536_vm0, %v5651_v41 }
 0x13f   : > { %5038 = vmatmul.mubr.msk.bf16.gmra.mrb[52].mxu1 %vm536_vm0, %v5652_v42 }
 0x140   : > { %5182 = vmatmul.mubr.msk.bf16.gmra.mrb[52].mxu0 %vm536_vm0, %v5653_v43  ;;  %5041 = vmatprep.mubr.msk.bf16.mxu1 %vm536_vm0, %v5654_v44 }
 0x141   : > { %5185 = vmatprep.mubr.msk.bf16.mxu0 %vm536_vm0, %v5655_v45 }
 0x147   : > { %5042 = vmatmul.mubr.msk.bf16.gmra.mrb[56].mxu1 %vm536_vm0, %v5656_v46 }
 0x148   : > { %5186 = vmatmul.mubr.msk.bf16.gmra.mrb[56].mxu0 %vm536_vm0, %v5657_v47  ;;  %5045 = vmatprep.mubr.msk.bf16.mxu1 %vm536_vm0, %v5658_v48 }
 0x149   : > { %5189 = vmatprep.mubr.msk.bf16.mxu0 %vm536_vm0, %v5659_v49 }
 0x14f   : > { %5046 = vmatmul.mubr.msk.bf16.gmra.mrb[60].mxu1 %vm536_vm0, %v5660_v50 }
 0x150   : > { %5190 = vmatmul.mubr.msk.bf16.gmra.mrb[60].mxu0 %vm536_vm0, %v5661_v51 }
 0x16a   : > { %v4915_v52 = vpop.f32.mrb[0].mxu1 }
 0x16b   : > { %v1236_v53 = vpop.f32.mrb[1].mxu1 }
 0x16c   : > { %v4916_v54 = vpop.f32.mrb[2].mxu1 }
 0x16d   : > { %v1239_v55 = vpop.f32.mrb[3].mxu1 }
 0x172   : > { %v4919_v56 = vpop.f32.mrb[4].mxu1 }
 0x173   : > { %v1252_v57 = vpop.f32.mrb[5].mxu1 }
 0x174   : > { %v4920_v58 = vpop.f32.mrb[6].mxu1 }
 0x175   : > { %v1255_v59 = vpop.f32.mrb[7].mxu1 }
 0x17a   : > { %v4923_v60 = vpop.f32.mrb[8].mxu1 }
 0x17b   : > { %v1268_v61 = vpop.f32.mrb[9].mxu1 }
 0x17c   : > { %v4924_v62 = vpop.f32.mrb[10].mxu1 }
 0x17d   : > { %v1271_v63 = vpop.f32.mrb[11].mxu1 }
 0x182   : > { %v4927_v0 = vpop.f32.mrb[12].mxu1 }
 0x183   : > { %v6136_v2 = vpop.f32.mrb[13].mxu1 }
 0x184   : > { %v6138_v4 = vpop.f32.mrb[14].mxu1 }
 0x185   : > { %v6140_v6 = vpop.f32.mrb[15].mxu1 }
 0x18a   : > { %v6142_v8 = vpop.f32.mrb[16].mxu1 }
 0x18b   : > { %v6144_v9 = vpop.f32.mrb[17].mxu1 }
 0x18c   : > { %v6146_v10 = vpop.f32.mrb[18].mxu1 }
 0x18d   : > { %v6148_v11 = vpop.f32.mrb[19].mxu1 }
 0x192   : > { %v6150_v12 = vpop.f32.mrb[20].mxu1 }
 0x193   : > { %v6152_v13 = vpop.f32.mrb[21].mxu1 }
 0x194   : > { %v6154_v14 = vpop.f32.mrb[22].mxu1 }
 0x195   : > { %v6156_v15 = vpop.f32.mrb[23].mxu1 }
 0x19a   : > { %v6158_v16 = vpop.f32.mrb[24].mxu1 }
 0x19b   : > { %v6160_v17 = vpop.f32.mrb[25].mxu1 }
 0x19c   : > { %v6162_v18 = vpop.f32.mrb[26].mxu1 }
 0x19d   : > { %v6164_v19 = vpop.f32.mrb[27].mxu1 }
 0x1a2   : > { %v6166_v20 = vpop.f32.mrb[28].mxu1 }
 0x1a3   : > { %v6168_v21 = vpop.f32.mrb[29].mxu1 }
 0x1a4   : > { %v6170_v22 = vpop.f32.mrb[30].mxu1 }
 0x1a5   : > { %v6172_v23 = vpop.f32.mrb[31].mxu1 }
 0x1ab   : > { %v5131_v24 = vpop.f32.mrb[0].mxu0 }
 0x1ac   : > { %v5201_v25 = vadd.f32 %v5131_v24, %v4915_v52  ;;  %v3308_v26 = vpop.f32.mrb[1].mxu0 }
 0x1ad   : > { %v5202_v28 = vadd.f32 %v3308_v26, %v1236_v53  ;;  %v5132_v29 = vpop.f32.mrb[2].mxu0 }
 0x1ae   : > { %v5203_v30 = vadd.f32 %v5132_v29, %v4916_v54  ;;  %v3311_v31 = vpop.f32.mrb[3].mxu0  ;;  %v3636_v7 = vadd.f32 %v5201_v25, %v6177_v27 }
 0x1af   : > { %v5204_v32 = vadd.f32 %v3311_v31, %v1239_v55  ;;  %v3634_v33 = vadd.f32 %v5202_v28, %v6177_v27 }
 0x1b0   : > { %v3700_v42 = vmax.f32 %v3636_v7, 0.0  ;;  %v3637_v43 = vadd.f32 %v5203_v30, %v6177_v27 }
 0x1b1   : > { %v3698_v1 = vmax.f32 %v3634_v33, 0.0  ;;  %v3635_v34 = vadd.f32 %v5204_v32, %v6177_v27 }
 0x1b2   : > { %v3701_v49 = vmax.f32 %v3637_v43, 0.0 }
 0x1b3   : > { %v5135_v3 = vpop.f32.mrb[4].mxu0  ;;  %3762 = vxpose.xlu0.b32.start [1/16] (narrow) %v3698_v1, 64  ;;  %v3699_v38 = vmax.f32 %v3635_v34, 0.0 }
 0x1b4   : > { %v5205_v35 = vadd.f32 %v5135_v3, %v4919_v56  ;;  %v3324_v5 = vpop.f32.mrb[5].mxu0 }
 0x1b5   : > { %v5206_v36 = vadd.f32 %v3324_v5, %v1252_v57  ;;  %v5136_v37 = vpop.f32.mrb[6].mxu0 }
 0x1b6   : > { %v5207_v39 = vadd.f32 %v5136_v37, %v4920_v58  ;;  %v3327_v40 = vpop.f32.mrb[7].mxu0  ;;  %v3640_v24 = vadd.f32 %v5205_v35, %v6177_v27 }
 0x1b7   : > { %v5208_v41 = vadd.f32 %v3327_v40, %v1255_v59  ;;  %3763 = vxpose.xlu0.b32.cont [2/16] (narrow) %v3699_v38, 64  ;;  %v3638_v50 = vadd.f32 %v5206_v36, %v6177_v27 }
 0x1b8   : > { %v3704_v26 = vmax.f32 %v3640_v24, 0.0  ;;  %v3641_v28 = vadd.f32 %v5207_v39, %v6177_v27 }
 0x1b9   : > { %v3702_v54 = vmax.f32 %v3638_v50, 0.0  ;;  %v3639_v55 = vadd.f32 %v5208_v41, %v6177_v27 }
 0x1ba   : > { %v3705_v32 = vmax.f32 %v3641_v28, 0.0 }
 0x1bb   : > { %v5139_v44 = vpop.f32.mrb[8].mxu0  ;;  %3764 = vxpose.xlu0.b32.cont [3/16] (narrow) %v3700_v42, 64 }
 0x1bc   : > { %v5209_v45 = vadd.f32 %v5139_v44, %v4923_v60  ;;  %v3340_v46 = vpop.f32.mrb[9].mxu0 }
 0x1bd   : > { %v5210_v47 = vadd.f32 %v3340_v46, %v1268_v61  ;;  %v5140_v48 = vpop.f32.mrb[10].mxu0  ;;  %v3703_v61 = vmax.f32 %v3639_v55, 0.0 }
 0x1be   : > { %v5211_v51 = vadd.f32 %v5140_v48, %v4924_v62  ;;  %v3343_v52 = vpop.f32.mrb[11].mxu0 }
 0x1bf   : > { %v5212_v53 = vadd.f32 %v3343_v52, %v1271_v63  ;;  %3765 = vxpose.xlu0.b32.cont [4/16] (narrow) %v3701_v49, 64  ;;  %v3642_v33 = vadd.f32 %v5210_v47, %v6177_v27 }
 0x1c0   : > { %v3645_v44 = vadd.f32 %v5211_v51, %v6177_v27 }
 0x1c1   : > { %v3706_v3 = vmax.f32 %v3642_v33, 0.0  ;;  %v3643_v5 = vadd.f32 %v5212_v53, %v6177_v27 }
 0x1c2   : > { %v3709_v49 = vmax.f32 %v3645_v44, 0.0 }
 0x1c3   : > { %v5143_v56 = vpop.f32.mrb[12].mxu0  ;;  %3766 = vxpose.xlu0.b32.cont [5/16] (narrow) %v3702_v54, 64  ;;  %v3707_v7 = vmax.f32 %v3643_v5, 0.0 }
 0x1c4   : > { %v6185_v57 = vadd.f32 %v5143_v56, %v4927_v0  ;;  %v3356_v58 = vpop.f32.mrb[13].mxu0 }
 0x1c5   : > { %v5214_v59 = vadd.f32 %v3356_v58, %v6136_v2  ;;  %v5144_v60 = vpop.f32.mrb[14].mxu0 }
 0x1c6   : > { %v6190_v25 = vadd.f32 %v5144_v60, %v6138_v4  ;;  %v3359_v62 = vpop.f32.mrb[15].mxu0 }
 0x1c7   : > { %v5216_v63 = vadd.f32 %v3359_v62, %v6140_v6  ;;  %3767 = vxpose.xlu0.b32.cont [6/16] (narrow) %v3703_v61, 64  ;;  %v3646_v52 = vadd.f32 %v5214_v59, %v6177_v27 }
 0x1c9   : > { %v3647_v58 = vadd.f32 %v5216_v63, %v6177_v27 }
 0x1cb   : > { %v5147_v29 = vpop.f32.mrb[16].mxu0  ;;  %3768 = vxpose.xlu0.b32.cont [7/16] (narrow) %v3704_v26, 64  ;;  %v3711_v62 = vmax.f32 %v3647_v58, 0.0 }
 0x1cc   : > { %v5217_v0 = vadd.f32 %v5147_v29, %v6142_v8  ;;  %v3372_v30 = vpop.f32.mrb[17].mxu0 }
 0x1cd   : > { %v5218_v2 = vadd.f32 %v3372_v30, %v6144_v9  ;;  %v5148_v31 = vpop.f32.mrb[18].mxu0 }
 0x1ce   : > { %v5219_v4 = vadd.f32 %v5148_v31, %v6146_v10  ;;  %v3375_v1 = vpop.f32.mrb[19].mxu0  ;;  %v3644_v10 = vadd.f32 %v5209_v45, %v6177_v27  ;;  %v3652_v40 = vadd.f32 %v5217_v0, %v6177_v27 }
 0x1cf   : > { %v5220_v6 = vadd.f32 %v3375_v1, %v6148_v11  ;;  %3769 = vxpose.xlu0.b32.cont [8/16] (narrow) %v3705_v32, 64  ;;  %v3650_v34 = vadd.f32 %v5218_v2, %v6177_v27 }
 0x1d0   : > { %v3716_v46 = vmax.f32 %v3652_v40, 0.0  ;;  %v3653_v45 = vadd.f32 %v5219_v4, %v6177_v27 }
 0x1d1   : > { %v3714_v35 = vmax.f32 %v3650_v34, 0.0  ;;  %v3651_v8 = vadd.f32 %v5220_v6, %v6177_v27 }
 0x1d3   : > { %v5151_v36 = vpop.f32.mrb[20].mxu0  ;;  %3770 = vxpose.xlu0.b32.cont [9/16] (narrow) %v3706_v3, 64  ;;  %3794 = vxpose.xlu1.b32.start [1/16] (narrow) %v3714_v35, 64  ;;  %v3715_v39 = vmax.f32 %v3651_v8, 0.0 }
 0x1d4   : > { %v5221_v9 = vadd.f32 %v5151_v36, %v6150_v12  ;;  %v3388_v37 = vpop.f32.mrb[21].mxu0  ;;  %v3708_v12 = vmax.f32 %v3644_v10, 0.0 }
 0x1d5   : > { %v5222_v38 = vadd.f32 %v3388_v37, %v6152_v13  ;;  %v5152_v11 = vpop.f32.mrb[22].mxu0 }
 0x1d6   : > { %v5223_v41 = vadd.f32 %v5152_v11, %v6154_v14  ;;  %v3391_v42 = vpop.f32.mrb[23].mxu0  ;;  %v3656_v63 = vadd.f32 %v5221_v9, %v6177_v27 }
 0x1d7   : > { %v5224_v43 = vadd.f32 %v3391_v42, %v6156_v15  ;;  %3771 = vxpose.xlu0.b32.cont [10/16] (narrow) %v3707_v7, 64  ;;  %3795 = vxpose.xlu1.b32.cont [2/16] (narrow) %v3715_v39, 64  ;;  %v3717_v15 = vmax.f32 %v3653_v45, 0.0  ;;  %v3654_v51 = vadd.f32 %v5222_v38, %v6177_v27 }
 0x1d8   : > { %v3720_v30 = vmax.f32 %v3656_v63, 0.0 }
 0x1d9   : > { %v3718_v56 = vmax.f32 %v3654_v51, 0.0 }
 0x1db   : > { %v5155_v47 = vpop.f32.mrb[24].mxu0  ;;  %3772 = vxpose.xlu0.b32.cont [11/16] (narrow) %v3708_v12, 64  ;;  %3796 = vxpose.xlu1.b32.cont [3/16] (narrow) %v3716_v46, 64 }
 0x1dc   : > { %v6211_v13 = vadd.f32 %v5155_v47, %v6158_v16  ;;  %v3404_v48 = vpop.f32.mrb[25].mxu0  ;;  %v3710_v16 = vmax.f32 %v3646_v52, 0.0 }
 0x1dd   : > { %v5226_v14 = vadd.f32 %v3404_v48, %v6160_v17  ;;  %v5156_v50 = vpop.f32.mrb[26].mxu0  ;;  %v3655_v17 = vadd.f32 %v5224_v43, %v6177_v27 }
 0x1de   : > { %v6217_v53 = vadd.f32 %v5156_v50, %v6162_v18  ;;  %v3407_v54 = vpop.f32.mrb[27].mxu0  ;;  %v3648_v18 = vadd.f32 %v6185_v57, %v6177_v27  ;;  %v3657_v57 = vadd.f32 %v5223_v41, %v6177_v27  ;;  %v3660_v43 = vadd.f32 %v6211_v13, %v6177_v27 }
 0x1df   : > { %v5228_v55 = vadd.f32 %v3407_v54, %v6164_v19  ;;  %3773 = vxpose.xlu0.b32.cont [12/16] (narrow) %v3709_v49, 64  ;;  %3797 = vxpose.xlu1.b32.cont [4/16] (narrow) %v3717_v15, 64  ;;  %v3719_v26 = vmax.f32 %v3655_v17, 0.0  ;;  %v3658_v35 = vadd.f32 %v5226_v14, %v6177_v27 }
 0x1e0   : > { %v3721_v3 = vmax.f32 %v3657_v57, 0.0  ;;  %v3661_v15 = vadd.f32 %v6217_v53, %v6177_v27  ;;  %v3724_v54 = vmax.f32 %v3660_v43, 0.0 }
 0x1e1   : > { %v3722_v37 = vmax.f32 %v3658_v35, 0.0  ;;  %v3659_v38 = vadd.f32 %v5228_v55, %v6177_v27 }
 0x1e3   : > { %v5159_v60 = vpop.f32.mrb[28].mxu0  ;;  %3774 = vxpose.xlu0.b32.cont [13/16] (narrow) %v3710_v16, 64  ;;  %3798 = vxpose.xlu1.b32.cont [5/16] (narrow) %v3718_v56, 64  ;;  %v3723_v48 = vmax.f32 %v3659_v38, 0.0 }
 0x1e4   : > { %v6223_v59 = vadd.f32 %v5159_v60, %v6166_v20  ;;  %v3420_v61 = vpop.f32.mrb[29].mxu0  ;;  %v3712_v20 = vmax.f32 %v3648_v18, 0.0  ;;  %v3725_v60 = vmax.f32 %v3661_v15, 0.0 }
 0x1e5   : > { %v6228_v19 = vadd.f32 %v3420_v61, %v6168_v21  ;;  %v5160_v24 = vpop.f32.mrb[30].mxu0  ;;  %v3649_v21 = vadd.f32 %v6190_v25, %v6177_v27 }
 0x1e6   : > { %v6232_v28 = vadd.f32 %v5160_v24, %v6170_v22  ;;  %v3423_v29 = vpop.f32.mrb[31].mxu0 }
 0x1e7   : > { %v6235_v0 = vadd.f32 %v3423_v29, %v6172_v23  ;;  %3775 = vxpose.xlu0.b32.cont [14/16] (narrow) %v3711_v62, 64  ;;  %3799 = vxpose.xlu1.b32.cont [6/16] (narrow) %v3719_v26, 64  ;;  %v3713_v34 = vmax.f32 %v3649_v21, 0.0  ;;  %v3662_v26 = vadd.f32 %v6228_v19, %v6177_v27 }
 0x1e9   : > { %v3726_v57 = vmax.f32 %v3662_v26, 0.0 }
 0x1ea   : > { %v5019_v2 = vpop.f32.mrb[32].mxu1 }
 0x1eb   : > { %v5163_v31 = vpop.f32.mrb[32].mxu0  ;;  %3776 = vxpose.xlu0.b32.cont [15/16] (narrow) %v3712_v20, 64  ;;  %3800 = vxpose.xlu1.b32.cont [7/16] (narrow) %v3720_v30, 64  ;;  %v2012_v32 = vpop.f32.mrb[33].mxu1 }
 0x1ec   : > { %v5233_v22 = vadd.f32 %v5163_v31, %v5019_v2  ;;  %v3436_v33 = vpop.f32.mrb[33].mxu0  ;;  %v5020_v4 = vpop.f32.mrb[34].mxu1  ;;  %v3663_v2 = vadd.f32 %v6235_v0, %v6177_v27 }
 0x1ed   : > { %v5234_v1 = vadd.f32 %v3436_v33, %v2012_v32  ;;  %v5164_v23 = vpop.f32.mrb[34].mxu0  ;;  %v2015_v6 = vpop.f32.mrb[35].mxu1 }
 0x1ee   : > { %v5235_v5 = vadd.f32 %v5164_v23, %v5020_v4  ;;  %v3439_v8 = vpop.f32.mrb[35].mxu0  ;;  %v3668_v44 = vadd.f32 %v5233_v22, %v6177_v27  ;;  %v3727_v0 = vmax.f32 %v3663_v2, 0.0 }
 0x1ef   : > { %v5236_v25 = vadd.f32 %v3439_v8, %v2015_v6  ;;  %3777 = vxpose.xlu0.b32.end [16/16] (narrow) %v3713_v34, 64  ;;  %3801 = vxpose.xlu1.b32.cont [8/16] (narrow) %v3721_v3, 64  ;;  %v3666_v36 = vadd.f32 %v5234_v1, %v6177_v27  ;;  %v3664_v1 = vadd.f32 %v6223_v59, %v6177_v27 }
 0x1f0   : > { %v3732_v52 = vmax.f32 %v3668_v44, 0.0  ;;  %v3669_v51 = vadd.f32 %v5235_v5, %v6177_v27  ;;  %v3665_v59 = vadd.f32 %v6232_v28, %v6177_v27 }
 0x1f1   : > { %v3667_v9 = vadd.f32 %v5236_v25, %v6177_v27  ;;  %v3730_v10 = vmax.f32 %v3666_v36, 0.0 }
 0x1f2   : > { %v5023_v11 = vpop.f32.mrb[36].mxu1  ;;  %v3733_v61 = vmax.f32 %v3669_v51, 0.0 }
 0x1f3   : > { %v5167_v7 = vpop.f32.mrb[36].mxu0  ;;  %3802 = vxpose.xlu1.b32.cont [9/16] (narrow) %v3722_v37, 64  ;;  %3826 = vxpose.xlu0.b32.start [1/16] (narrow) %v3730_v10, 64  ;;  %v2028_v39 = vpop.f32.mrb[37].mxu1  ;;  %v3731_v12 = vmax.f32 %v3667_v9, 0.0  ;;  %v3728_v37 = vmax.f32 %v3664_v1, 0.0 }
 0x1f4   : > { %v5237_v40 = vadd.f32 %v5167_v7, %v5023_v11  ;;  %v3452_v41 = vpop.f32.mrb[37].mxu0  ;;  %v5024_v42 = vpop.f32.mrb[38].mxu1 }
 0x1f5   : > { %v5238_v46 = vadd.f32 %v3452_v41, %v2028_v39  ;;  %v5168_v45 = vpop.f32.mrb[38].mxu0  ;;  %v2031_v47 = vpop.f32.mrb[39].mxu1 }
 0x1f6   : > { %v5239_v49 = vadd.f32 %v5168_v45, %v5024_v42  ;;  %v3455_v14 = vpop.f32.mrb[39].mxu0  ;;  %v3672_v23 = vadd.f32 %v5237_v40, %v6177_v27 }
 0x1f7   : > { %v5240_v50 = vadd.f32 %v3455_v14, %v2031_v47  ;;  %3803 = vxpose.xlu1.b32.cont [10/16] (narrow) %v3723_v48, 64  ;;  %3827 = vxpose.xlu0.b32.cont [2/16] (narrow) %v3731_v12, 64  ;;  %v3670_v18 = vadd.f32 %v5238_v46, %v6177_v27  ;;  %v3729_v46 = vmax.f32 %v3665_v59, 0.0 }
 0x1f8   : > { %v3736_v36 = vmax.f32 %v3672_v23, 0.0  ;;  %v3673_v9 = vadd.f32 %v5239_v49, %v6177_v27 }
 0x1f9   : > { %v3734_v30 = vmax.f32 %v3670_v18, 0.0  ;;  %v3671_v21 = vadd.f32 %v5240_v50, %v6177_v27 }
 0x1fa   : > { %v5027_v13 = vpop.f32.mrb[40].mxu1  ;;  %v3737_v41 = vmax.f32 %v3673_v9, 0.0 }
 0x1fb   : > { %v5171_v55 = vpop.f32.mrb[40].mxu0  ;;  %3804 = vxpose.xlu1.b32.cont [11/16] (narrow) %v3724_v54, 64  ;;  %3828 = vxpose.xlu0.b32.cont [3/16] (narrow) %v3732_v52, 64  ;;  %v2044_v16 = vpop.f32.mrb[41].mxu1  ;;  %v3735_v6 = vmax.f32 %v3671_v21, 0.0 }
 0x1fc   : > { %v6250_v56 = vadd.f32 %v5171_v55, %v5027_v13  ;;  %v3468_v58 = vpop.f32.mrb[41].mxu0  ;;  %v5028_v17 = vpop.f32.mrb[42].mxu1 }
 0x1fd   : > { %v5242_v24 = vadd.f32 %v3468_v58, %v2044_v16  ;;  %v5172_v62 = vpop.f32.mrb[42].mxu0  ;;  %v2047_v53 = vpop.f32.mrb[43].mxu1 }
 0x1fe   : > { %v6255_v63 = vadd.f32 %v5172_v62, %v5028_v17  ;;  %v3471_v29 = vpop.f32.mrb[43].mxu0  ;;  %v3676_v13 = vadd.f32 %v6250_v56, %v6177_v27 }
 0x1ff   : > { %v5244_v20 = vadd.f32 %v3471_v29, %v2047_v53  ;;  %3805 = vxpose.xlu1.b32.cont [12/16] (narrow) %v3725_v60, 64  ;;  %3829 = vxpose.xlu0.b32.cont [4/16] (narrow) %v3733_v61, 64  ;;  %v3674_v42 = vadd.f32 %v5242_v24, %v6177_v27 }
 0x201   : > { %v3738_v49 = vmax.f32 %v3674_v42, 0.0  ;;  %v3675_v14 = vadd.f32 %v5244_v20, %v6177_v27  ;;  %v3677_v20 = vadd.f32 %v6255_v63, %v6177_v27 }
 0x202   : > { %v5031_v31 = vpop.f32.mrb[44].mxu1 }
 0x203   : > { %v5175_v32 = vpop.f32.mrb[44].mxu0  ;;  %3806 = vxpose.xlu1.b32.cont [13/16] (narrow) %v3726_v57, 64  ;;  %3830 = vxpose.xlu0.b32.cont [5/16] (narrow) %v3734_v30, 64  ;;  %v2060_v22 = vpop.f32.mrb[45].mxu1  ;;  %v3739_v17 = vmax.f32 %v3675_v14, 0.0  ;;  %v3740_v30 = vmax.f32 %v3676_v13, 0.0 }
 0x204   : > { %v6260_v33 = vadd.f32 %v5175_v32, %v5031_v31  ;;  %v3484_v19 = vpop.f32.mrb[45].mxu0  ;;  %v5032_v4 = vpop.f32.mrb[46].mxu1  ;;  %v3741_v32 = vmax.f32 %v3677_v20, 0.0 }
 0x205   : > { %v6265_v34 = vadd.f32 %v3484_v19, %v2060_v22  ;;  %v5176_v3 = vpop.f32.mrb[46].mxu0  ;;  %v2063_v35 = vpop.f32.mrb[47].mxu1 }
 0x206   : > { %v6267_v5 = vadd.f32 %v5176_v3, %v5032_v4  ;;  %v3487_v8 = vpop.f32.mrb[47].mxu0 }
 0x207   : > { %v6269_v25 = vadd.f32 %v3487_v8, %v2063_v35  ;;  %3807 = vxpose.xlu1.b32.cont [14/16] (narrow) %v3727_v0, 64  ;;  %3831 = vxpose.xlu0.b32.cont [6/16] (narrow) %v3735_v6, 64  ;;  %v3678_v1 = vadd.f32 %v6265_v34, %v6177_v27 }
 0x209   : > { %v3742_v9 = vmax.f32 %v3678_v1, 0.0 }
 0x20a   : > { %v5035_v10 = vpop.f32.mrb[48].mxu1 }
 0x20b   : > { %v5179_v38 = vpop.f32.mrb[48].mxu0  ;;  %3808 = vxpose.xlu1.b32.cont [15/16] (narrow) %v3728_v37, 64  ;;  %3832 = vxpose.xlu0.b32.cont [7/16] (narrow) %v3736_v36, 64  ;;  %v2076_v11 = vpop.f32.mrb[49].mxu1  ;;  %v3679_v37 = vadd.f32 %v6269_v25, %v6177_v27 }
 0x20c   : > { %v5249_v7 = vadd.f32 %v5179_v38, %v5035_v10  ;;  %v3500_v39 = vpop.f32.mrb[49].mxu0  ;;  %v5036_v40 = vpop.f32.mrb[50].mxu1 }
 0x20d   : > { %v5250_v43 = vadd.f32 %v3500_v39, %v2076_v11  ;;  %v5180_v44 = vpop.f32.mrb[50].mxu0  ;;  %v2079_v12 = vpop.f32.mrb[51].mxu1  ;;  %v3743_v42 = vmax.f32 %v3679_v37, 0.0 }
 0x20e   : > { %v5251_v45 = vadd.f32 %v5180_v44, %v5036_v40  ;;  %v3503_v47 = vpop.f32.mrb[51].mxu0  ;;  %v3684_v60 = vadd.f32 %v5249_v7, %v6177_v27  ;;  %v3680_v7 = vadd.f32 %v6260_v33, %v6177_v27  ;;  %v3681_v33 = vadd.f32 %v6267_v5, %v6177_v27 }
 0x20f   : > { %v5252_v48 = vadd.f32 %v3503_v47, %v2079_v12  ;;  %3809 = vxpose.xlu1.b32.end [16/16] (narrow) %v3729_v46, 64  ;;  %3833 = vxpose.xlu0.b32.cont [8/16] (narrow) %v3737_v41, 64  ;;  %v3682_v28 = vadd.f32 %v5250_v43, %v6177_v27 }
 0x210   : > { %v3748_v56 = vmax.f32 %v3684_v60, 0.0  ;;  %v3685_v21 = vadd.f32 %v5251_v45, %v6177_v27 }
 0x211   : > { %v3683_v50 = vadd.f32 %v5252_v48, %v6177_v27  ;;  %v3746_v15 = vmax.f32 %v3682_v28, 0.0  ;;  %v3744_v28 = vmax.f32 %v3680_v7, 0.0 }
 0x212   : > { %v5039_v52 = vpop.f32.mrb[52].mxu1  ;;  %v3749_v23 = vmax.f32 %v3685_v21, 0.0 }
 0x213   : > { %v5183_v51 = vpop.f32.mrb[52].mxu0  ;;  %3834 = vxpose.xlu0.b32.cont [9/16] (narrow) %v3738_v49, 64  ;;  %3858 = vxpose.xlu1.b32.start [1/16] (narrow) %v3746_v15, 64  ;;  %v2092_v54 = vpop.f32.mrb[53].mxu1  ;;  %v3747_v61 = vmax.f32 %v3683_v50, 0.0  ;;  %v3745_v50 = vmax.f32 %v3681_v33, 0.0 }
 0x214   : > { %v5253_v55 = vadd.f32 %v5183_v51, %v5039_v52  ;;  %v3516_v16 = vpop.f32.mrb[53].mxu0  ;;  %v5040_v58 = vpop.f32.mrb[54].mxu1 }
 0x215   : > { %v5254_v18 = vadd.f32 %v3516_v16, %v2092_v54  ;;  %v5184_v24 = vpop.f32.mrb[54].mxu0  ;;  %v2095_v62 = vpop.f32.mrb[55].mxu1 }
 0x216   : > { %v5255_v53 = vadd.f32 %v5184_v24, %v5040_v58  ;;  %v3519_v26 = vpop.f32.mrb[55].mxu0  ;;  %v3688_v43 = vadd.f32 %v5253_v55, %v6177_v27 }
 0x217   : > { %v5256_v29 = vadd.f32 %v3519_v26, %v2095_v62  ;;  %3835 = vxpose.xlu0.b32.cont [10/16] (narrow) %v3739_v17, 64  ;;  %3859 = vxpose.xlu1.b32.cont [2/16] (narrow) %v3747_v61, 64  ;;  %v3686_v6 = vadd.f32 %v5254_v18, %v6177_v27 }
 0x218   : > { %v3752_v49 = vmax.f32 %v3688_v43, 0.0  ;;  %v3689_v14 = vadd.f32 %v5255_v53, %v6177_v27 }
 0x219   : > { %v3750_v59 = vmax.f32 %v3686_v6, 0.0  ;;  %v3687_v10 = vadd.f32 %v5256_v29, %v6177_v27 }
 0x21a   : > { %v5043_v57 = vpop.f32.mrb[56].mxu1  ;;  %v3753_v15 = vmax.f32 %v3689_v14, 0.0 }
 0x21b   : > { %v5187_v2 = vpop.f32.mrb[56].mxu0  ;;  %3836 = vxpose.xlu0.b32.cont [11/16] (narrow) %v3740_v30, 64  ;;  %3860 = vxpose.xlu1.b32.cont [3/16] (narrow) %v3748_v56, 64  ;;  %v2108_v31 = vpop.f32.mrb[57].mxu1  ;;  %v3751_v44 = vmax.f32 %v3687_v10, 0.0 }
 0x21c   : > { %v5257_v22 = vadd.f32 %v5187_v2, %v5043_v57  ;;  %v3532_v19 = vpop.f32.mrb[57].mxu0  ;;  %v5044_v4 = vpop.f32.mrb[58].mxu1 }
 0x21d   : > { %v5258_v63 = vadd.f32 %v3532_v19, %v2108_v31  ;;  %v5188_v3 = vpop.f32.mrb[58].mxu0  ;;  %v2111_v35 = vpop.f32.mrb[59].mxu1 }
 0x21e   : > { %v5259_v0 = vadd.f32 %v5188_v3, %v5044_v4  ;;  %v3535_v8 = vpop.f32.mrb[59].mxu0  ;;  %v3692_v13 = vadd.f32 %v5257_v22, %v6177_v27 }
 0x21f   : > { %v5260_v36 = vadd.f32 %v3535_v8, %v2111_v35  ;;  %3837 = vxpose.xlu0.b32.cont [12/16] (narrow) %v3741_v32, 64  ;;  %3861 = vxpose.xlu1.b32.cont [4/16] (narrow) %v3749_v23, 64  ;;  %v3690_v52 = vadd.f32 %v5258_v63, %v6177_v27 }
 0x220   : > { %v3756_v58 = vmax.f32 %v3692_v13, 0.0  ;;  %v3693_v17 = vadd.f32 %v5259_v0, %v6177_v27 }
 0x221   : > { %v3754_v51 = vmax.f32 %v3690_v52, 0.0  ;;  %v3691_v54 = vadd.f32 %v5260_v36, %v6177_v27 }
 0x222   : > { %v5047_v38 = vpop.f32.mrb[60].mxu1  ;;  %v3757_v61 = vmax.f32 %v3693_v17, 0.0 }
 0x223   : > { %v5191_v34 = vpop.f32.mrb[60].mxu0  ;;  %3838 = vxpose.xlu0.b32.cont [13/16] (narrow) %v3742_v9, 64  ;;  %3862 = vxpose.xlu1.b32.cont [5/16] (narrow) %v3750_v59, 64  ;;  %v2124_v11 = vpop.f32.mrb[61].mxu1  ;;  %v3755_v55 = vmax.f32 %v3691_v54, 0.0 }
 0x224   : > { %v5261_v39 = vadd.f32 %v5191_v34, %v5047_v38  ;;  %v3548_v40 = vpop.f32.mrb[61].mxu0  ;;  %v5048_v41 = vpop.f32.mrb[62].mxu1 }
 0x225   : > { %v5262_v12 = vadd.f32 %v3548_v40, %v2124_v11  ;;  %v5192_v25 = vpop.f32.mrb[62].mxu0  ;;  %v2127_v46 = vpop.f32.mrb[63].mxu1 }
 0x226   : > { %v5263_v45 = vadd.f32 %v5192_v25, %v5048_v41  ;;  %v3551_v47 = vpop.f32.mrb[63].mxu0  ;;  %v3696_v29 = vadd.f32 %v5261_v39, %v6177_v27 }
 0x227   : > { %v5264_v48 = vadd.f32 %v3551_v47, %v2127_v46  ;;  %3839 = vxpose.xlu0.b32.cont [14/16] (narrow) %v3743_v42, 64  ;;  %3863 = vxpose.xlu1.b32.cont [6/16] (narrow) %v3751_v44, 64  ;;  %v3694_v18 = vadd.f32 %v5262_v12, %v6177_v27 }
 0x228   : > { %v3760_v56 = vmax.f32 %v3696_v29, 0.0  ;;  %v3697_v21 = vadd.f32 %v5263_v45, %v6177_v27 }
 0x229   : > { %v3758_v62 = vmax.f32 %v3694_v18, 0.0  ;;  %v3695_v53 = vadd.f32 %v5264_v48, %v6177_v27 }
 0x22a   : > { %v3761_v2 = vmax.f32 %v3697_v21, 0.0 }
 0x22b   : > { %3840 = vxpose.xlu0.b32.cont [15/16] (narrow) %v3744_v28, 64  ;;  %3864 = vxpose.xlu1.b32.cont [7/16] (narrow) %v3752_v49, 64  ;;  %v3759_v20 = vmax.f32 %v3695_v53, 0.0 }
 0x22f   : > { %3841 = vxpose.xlu0.b32.end [16/16] (narrow) %v3745_v50, 64  ;;  %3865 = vxpose.xlu1.b32.cont [8/16] (narrow) %v3753_v15, 64 }
 0x233   : > { %3866 = vxpose.xlu1.b32.cont [9/16] (narrow) %v3754_v51, 64  ;;  %v3778_v5 = vpop.trf.xlu0 }
 0x234   : > { %3890 = vst [vmem:[%s6302_s19] sm:$0xff] %v3778_v5 }
 0x237   : > { %3867 = vxpose.xlu1.b32.cont [10/16] (narrow) %v3755_v55, 64  ;;  %v3779_v16 = vpop.trf.xlu0 }
 0x238   : > { %3894 = vst [vmem:[%s6302_s19 + $0x20] sm:$0xff] %v3779_v16 }
 0x23b   : > { %3868 = vxpose.xlu1.b32.cont [11/16] (narrow) %v3756_v58, 64  ;;  %v3780_v60 = vpop.trf.xlu0 }
 0x23c   : > { %3898 = vst [vmem:[%s6302_s19 + $0x40] sm:$0xff] %v3780_v60 }
 0x23f   : > { %3869 = vxpose.xlu1.b32.cont [12/16] (narrow) %v3757_v61, 64  ;;  %v3781_v24 = vpop.trf.xlu0 }
 0x240   : > { %3902 = vst [vmem:[%s6302_s19 + $0x60] sm:$0xff] %v3781_v24 }
 0x243   : > { %3870 = vxpose.xlu1.b32.cont [13/16] (narrow) %v3758_v62, 64  ;;  %v3782_v26 = vpop.trf.xlu0 }
 0x244   : > { %3906 = vst [vmem:[%s6302_s19 + $0x80] sm:$0xff] %v3782_v26 }
 0x247   : > { %3871 = vxpose.xlu1.b32.cont [14/16] (narrow) %v3759_v20, 64  ;;  %v3783_v30 = vpop.trf.xlu0 }
 0x248   : > { %3910 = vst [vmem:[%s6302_s19 + $0xa0] sm:$0xff] %v3783_v30 }
 0x24b   : > { %3872 = vxpose.xlu1.b32.cont [15/16] (narrow) %v3760_v56, 64  ;;  %v3784_v57 = vpop.trf.xlu0 }
 0x24c   : > { %3914 = vst [vmem:[%s6302_s19 + $0xc0] sm:$0xff] %v3784_v57 }
 0x24f   : > { %3873 = vxpose.xlu1.b32.end [16/16] (narrow) %v3761_v2, 64  ;;  %v3785_v31 = vpop.trf.xlu0 }
 0x250   : > { %3918 = vst [vmem:[%s6302_s19 + $0xe0] sm:$0xff] %v3785_v31 }
 0x253   : > { %v3810_v32 = vpop.trf.xlu1 }
 0x254   : > { %3891 = vst [vmem:[%s6302_s19 + $0x8] sm:$0xff] %v3810_v32 }
 0x257   : > { %v3811_v22 = vpop.trf.xlu1 }
 0x258   : > { %3895 = vst [vmem:[%s6302_s19 + $0x28] sm:$0xff] %v3811_v22 }
 0x25b   : > { %v3812_v19 = vpop.trf.xlu1 }
 0x25c   : > { %3899 = vst [vmem:[%s6302_s19 + $0x48] sm:$0xff] %v3812_v19 }
 0x25f   : > { %v3813_v27 = vpop.trf.xlu1 }
 0x260   : > { %3903 = vst [vmem:[%s6302_s19 + $0x68] sm:$0xff] %v3813_v27 }
 0x263   : > { %v3814_v4 = vpop.trf.xlu1 }
 0x264   : > { %3907 = vst [vmem:[%s6302_s19 + $0x88] sm:$0xff] %v3814_v4 }
 0x267   : > { %v3815_v1 = vpop.trf.xlu1 }
 0x268   : > { %3911 = vst [vmem:[%s6302_s19 + $0xa8] sm:$0xff] %v3815_v1 }
 0x26b   : > { %v3816_v23 = vpop.trf.xlu1 }
 0x26c   : > { %3915 = vst [vmem:[%s6302_s19 + $0xc8] sm:$0xff] %v3816_v23 }
 0x26f   : > { %v3817_v6 = vpop.trf.xlu1 }
 0x270   : > { %3919 = vst [vmem:[%s6302_s19 + $0xe8] sm:$0xff] %v3817_v6 }
 0x273   : > { %v3842_v63 = vpop.trf.xlu0 }
 0x274   : > { %3892 = vst [vmem:[%s6302_s19 + $0x10] sm:$0xff] %v3842_v63 }
 0x277   : > { %v3843_v3 = vpop.trf.xlu0 }
 0x278   : > { %3896 = vst [vmem:[%s6302_s19 + $0x30] sm:$0xff] %v3843_v3 }
 0x27b   : > { %v3844_v35 = vpop.trf.xlu0 }
 0x27c   : > { %3900 = vst [vmem:[%s6302_s19 + $0x50] sm:$0xff] %v3844_v35 }
 0x27f   : > { %v3845_v0 = vpop.trf.xlu0 }
 0x280   : > { %3904 = vst [vmem:[%s6302_s19 + $0x70] sm:$0xff] %v3845_v0 }
 0x283   : > { %v3846_v8 = vpop.trf.xlu0 }
 0x284   : > { %3908 = vst [vmem:[%s6302_s19 + $0x90] sm:$0xff] %v3846_v8 }
 0x287   : > { %v3847_v36 = vpop.trf.xlu0 }
 0x288   : > { %3912 = vst [vmem:[%s6302_s19 + $0xb0] sm:$0xff] %v3847_v36 }
 0x28b   : > { %v3848_v9 = vpop.trf.xlu0 }
 0x28c   : > { %3916 = vst [vmem:[%s6302_s19 + $0xd0] sm:$0xff] %v3848_v9 }
 0x28f   : > { %v3849_v37 = vpop.trf.xlu0 }
 0x290   : > { %3920 = vst [vmem:[%s6302_s19 + $0xf0] sm:$0xff] %v3849_v37 }
 0x293   : > { %v3874_v59 = vpop.trf.xlu1 }
 0x294   : > { %3893 = vst [vmem:[%s6302_s19 + $0x18] sm:$0xff] %v3874_v59 }
 0x297   : > { %v3875_v10 = vpop.trf.xlu1 }
 0x298   : > { %3897 = vst [vmem:[%s6302_s19 + $0x38] sm:$0xff] %v3875_v10 }
 0x29b   : > { %v3876_v38 = vpop.trf.xlu1 }
 0x29c   : > { %3901 = vst [vmem:[%s6302_s19 + $0x58] sm:$0xff] %v3876_v38 }
 0x29f   : > { %v3877_v34 = vpop.trf.xlu1 }
 0x2a0   : > { %3905 = vst [vmem:[%s6302_s19 + $0x78] sm:$0xff] %v3877_v34 }
 0x2a3   : > { %v3878_v11 = vpop.trf.xlu1 }
 0x2a4   : > { %3909 = vst [vmem:[%s6302_s19 + $0x98] sm:$0xff] %v3878_v11 }
 0x2a7   : > { %v3879_v7 = vpop.trf.xlu1 }
 0x2a8   : > { %3913 = vst [vmem:[%s6302_s19 + $0xb8] sm:$0xff] %v3879_v7 }
 0x2ab   : > { %v3880_v39 = vpop.trf.xlu1 }
 0x2ac   : > { %3917 = vst [vmem:[%s6302_s19 + $0xd8] sm:$0xff] %v3880_v39 }
 0x2af   : > { %v3881_v40 = vpop.trf.xlu1 }
 0x2b0   : > { %3921 = vst [vmem:[%s6302_s19 + $0xf8] sm:$0xff] %v3881_v40 }
 0x2b1 PF: > { %s13_s14 = sadd.s32 1, %s5684_s14   ;;  %s6355_s12 = smov %s5680_s13 }
 0x2b2   : > { %p10_p5 = scmp.ge.s32.totalorder %s13_s14, 4   ;;  %s6356_s13 = smov %s6358_s15 }
 0x2b4   :  { %12 = sbr.rel (!%p10_p5) target bundleno = 2 (0x2), region = 71 }

</bundles_post_ra>
